<compile_context>
chip_gen: v7x
topology: tpu7x:2x2x1
jax: 0.10.0
libtpu: 0.0.40
codegen_flags: <defaults>
</compile_context>

<pallas_src>
import math

import jax
import jax.numpy as jnp
from jax import lax
from jax.experimental import pallas as pl
from jax.experimental.pallas import tpu as pltpu

NUM_KERNELS = 6                 # module default
MAX_R = NUM_KERNELS // 2        # = 3 -> max shift radius of the "plus" kernel
N_CONVS = NUM_KERNELS + 1       # 7 convs averaged


def _tap_offsets():
    offs = [(0, dw) for dw in range(-MAX_R, MAX_R + 1)]          # horizontal row
    offs += [(dh, 0) for dh in range(-MAX_R, MAX_R + 1) if dh]   # vertical column
    return tuple(offs)


TAP_OFFSETS = _tap_offsets()    # 13 taps of the effective "plus" kernel


# ------------------------------- Pallas kernel -------------------------------
def _make_kernel(H, W, Cin, cpad, Wp, Hp, L, flat_offsets, n_jtiles):
    R = MAX_R
    n_taps = len(flat_offsets)

    def build_and_matmul(x_ref, w_ref, b_ref, o_ref, xp_ref, col_ref):
        """Halo build + im2col staging interleaved with per-tap accumulating
        MXU matmuls.  Runs once per image (j == 0)."""
        # --- 1) halo build in bf16, zeroing ONLY the border strips -----------
        # Invariant: the zeroed regions below are never touched by the data
        # copies, so they stay valid for every later read of xp within this
        # image.  (Leading block, per-row gap, trailing block cover exactly
        # the complement of the data windows.)
        xp_ref[:, pl.ds(0, R * Wp + R)] = jnp.zeros((Cin, R * Wp + R),
                                                    jnp.bfloat16)
        zgap = jnp.zeros((Cin, Wp - W), jnp.bfloat16)            # hoisted

        def row_body(h, carry):
            base = (h + R) * Wp + R
            xp_ref[:, pl.ds(base, W)] = (
                x_ref[0, :, pl.ds(h * W, W)].astype(jnp.bfloat16))
            # right pad of row h + left pad of row h+1 (contiguous flat span)
            xp_ref[:, pl.ds(base + W, Wp - W)] = zgap
            return carry

        lax.fori_loop(0, H, row_body, 0, unroll=True)

        tail = (H + R) * Wp + R
        xp_ref[:, pl.ds(tail, Hp * Wp - tail)] = jnp.zeros(
            (Cin, Hp * Wp - tail), jnp.bfloat16)

        # --- 2) zero only the (cpad - Cin) pad rows of each tap block --------
        # (needed so stale VMEM NaN/inf cannot leak through 0-weight columns;
        #  these rows are never written by the tap copies below.)
        if cpad != Cin:
            zpad = jnp.zeros((cpad - Cin, L), jnp.bfloat16)
            for t in range(n_taps):
                col_ref[pl.ds(t * cpad + Cin, cpad - Cin), :] = zpad

        # --- 3) tap copy interleaved with accumulating per-tap matmul --------
        # Copy for tap t+1 is independent of the matmul for tap t, so the
        # scheduler co-issues vst/vld with vmatmul instead of serializing the
        # whole staging phase ahead of one big matmul.
        for t, off in enumerate(flat_offsets):
            col_ref[pl.ds(t * cpad, Cin), :] = xp_ref[:, pl.ds(off, L)]
            part = jnp.dot(w_ref[:, pl.ds(t * cpad, cpad)],
                           col_ref[pl.ds(t * cpad, cpad), :],
                           preferred_element_type=jnp.float32)   # (tCout, L)
            if t == 0:
                o_ref[0] = part + b_ref[...]
            else:
                o_ref[0] += part

    def fused_matmul(w_ref, b_ref, o_ref, col_ref):
        """Reuse the staged col for subsequent Cout tiles: one fused MXU
        matmul with K = 13*cpad (high K-occupancy, zero staging work)."""
        o_ref[0] = (jnp.dot(w_ref[...], col_ref[...],
                            preferred_element_type=jnp.float32)
                    + b_ref[...])

    def kernel(x_ref, w_ref, b_ref, o_ref, xp_ref, col_ref):
        # x_ref  : (1, Cin, H*W)   f32   original NCHW image, flattened
        # w_ref  : (tCout, K)      bf16  effective tap weights, 1/7 folded in
        # b_ref  : (tCout, 1)      f32   mean bias
        # o_ref  : (1, tCout, L)   f32   lane-dense flat output (L = H*Wp)
        # xp_ref : (Cin, Hp*Wp)    bf16  zero-padded flat image (scratch)
        # col_ref: (K, L)          bf16  im2col staging buffer (scratch)
        if n_jtiles == 1:
            build_and_matmul(x_ref, w_ref, b_ref, o_ref, xp_ref, col_ref)
        else:
            j = pl.program_id(1)

            @pl.when(j == 0)
            def _():
                build_and_matmul(x_ref, w_ref, b_ref, o_ref, xp_ref, col_ref)

            @pl.when(j != 0)
            def _():
                fused_matmul(w_ref, b_ref, o_ref, col_ref)

    return kernel


# ---------------------- host-side parameter folding (tiny) -------------------
def _fold_params(weights, biases, cin, cout_pad, cpad):
    """Fold the 7 conv kernels into per-tap (Cout, Cin) matrices, scale by 1/7,
    pad channels to (cout_pad, cpad), flatten to (cout_pad, 13*cpad) bf16."""
    cout = weights[0].shape[0]
    n_convs = len(weights)
    taps = {off: jnp.zeros((cout, cin), jnp.float32) for off in TAP_OFFSETS}
    for w in weights:
        _, _, kh, kw = w.shape
        if kh == 1 and kw == 1:
            taps[(0, 0)] = taps[(0, 0)] + w[:, :, 0, 0]
        elif kh == 1:                       # 1 x kw, along W
            c = kw // 2
            for j in range(kw):
                taps[(0, j - c)] = taps[(0, j - c)] + w[:, :, 0, j]
        else:                               # kh x 1, along H
            c = kh // 2
            for j in range(kh):
                taps[(j - c, 0)] = taps[(j - c, 0)] + w[:, :, j, 0]

    t_count = len(TAP_OFFSETS)
    w_eff = jnp.zeros((cout_pad, t_count, cpad), jnp.float32)
    for t, off in enumerate(TAP_OFFSETS):
        w_eff = w_eff.at[:cout, t, :cin].set(taps[off] / float(n_convs))
    w_eff = w_eff.reshape(cout_pad, t_count * cpad).astype(jnp.bfloat16)

    b = jnp.zeros((cout_pad, 1), jnp.float32)
    b = b.at[:cout, 0].set((sum(biases) / float(n_convs)).astype(jnp.float32))
    return w_eff, b


# --------------------------------- wrapper -----------------------------------
def inception_block_v2(x_nchw, weights, biases, *, cout_tile=None):
    """x_nchw: (N, Cin, H, W) float32.  Returns (N, Cout, H, W) float32."""
    N, Cin, H, W = x_nchw.shape
    Cout = weights[0].shape[0]
    R = MAX_R

    # Flat padded-width geometry: a (dh, dw) tap becomes a single 1-D shift of
    # the flattened padded image.  Wp is the smallest width >= W + 2R such that
    # L = H*Wp is an EXACT multiple of 128 (lane-dense, unmasked stores).
    step = 128 // math.gcd(H, 128)
    Wp = ((W + 2 * R + step - 1) // step) * step
    Hp = H + 2 * R + 1                    # +1 slack row keeps shifted reads in bounds
    L = H * Wp
    assert L % 128 == 0, "L must be lane-exact"

    cpad = ((Cin + 15) // 16) * 16        # bf16 (16,128) tile-aligned per-tap block
    K = len(TAP_OFFSETS) * cpad
    flat_offsets = tuple((R + dh) * Wp + (R + dw) for (dh, dw) in TAP_OFFSETS)

    # Cout tiling: 256 matches the v6e/v7x 2x256^2 MXU; 128 for small Cout /
    # v5e.  Pad Cout host-side to a tile multiple so no grid step multiplies
    # garbage weight rows.
    if cout_tile is None:
        cout_tile = 256 if Cout >= 256 else 128
    Cout_pad = ((Cout + 7) // 8) * 8
    tCout = min(cout_tile, Cout_pad)
    Cout_pad = ((Cout_pad + tCout - 1) // tCout) * tCout
    n_jtiles = Cout_pad // tCout

    w_eff, b = _fold_params(weights, biases, Cin, Cout_pad, cpad)

    # NCHW stays put: (N, Cin, H, W) -> (N, Cin, H*W) is a free reshape; the
    # f32 -> bf16 cast happens once in-kernel during the halo build.
    x_flat = x_nchw.astype(jnp.float32).reshape(N, Cin, H * W)

    # VMEM budget: scratch + double-buffered in/out blocks.
    vmem_need = (Cin * Hp * Wp * 2            # xp (bf16)
                 + K * L * 2                  # col (bf16)
                 + 2 * Cin * H * W * 4        # input block, double-buffered
                 + 2 * tCout * K * 2          # weight block
                 + 2 * tCout * 4              # bias block
                 + 2 * tCout * L * 4)         # output block
    # TODO(synk): add a row-tile grid axis (with halo refetch) once vmem_need
    # approaches v7x's 64 MiB per-TC VMEM.
    assert vmem_need < (56 << 20), "shape too large: needs a row-tile grid axis"
    vmem_limit = int(min(max(2 * vmem_need, 32 << 20), 64 << 20))

    grid = (N, n_jtiles)

    out_flat = pl.pallas_call(
        _make_kernel(H, W, Cin, cpad, Wp, Hp, L, flat_offsets, n_jtiles),
        out_shape=jax.ShapeDtypeStruct((N, Cout_pad, L), jnp.float32),
        grid=grid,
        in_specs=[
            pl.BlockSpec((1, Cin, H * W), lambda n, j: (n, 0, 0)),
            pl.BlockSpec((tCout, K), lambda n, j: (j, 0)),
            pl.BlockSpec((tCout, 1), lambda n, j: (j, 0)),
        ],
        out_specs=pl.BlockSpec((1, tCout, L), lambda n, j: (n, j, 0)),
        scratch_shapes=[
            pltpu.VMEM((Cin, Hp * Wp), jnp.bfloat16),   # padded flat image
            pltpu.VMEM((K, L), jnp.bfloat16),           # im2col staging buffer
        ],
        compiler_params=pltpu.CompilerParams(
            dimension_semantics=("parallel", "arbitrary"),
            vmem_limit_bytes=vmem_limit),
    )(x_flat, w_eff, b)

    # Crop the Cout / width padding and restore NCHW (reshape is free; the
    # slice is a lane-dense copy -- see TODO at the top about skipping it).
    return out_flat.reshape(N, Cout_pad, H, Wp)[:, :Cout, :, :W]


# ----------------------- deterministic parameter init ------------------------
def init_params(key, in_channels, out_channels, num_kernels=NUM_KERNELS):
    """Kaiming-normal (fan_out, relu) conv weights like the module's __init__.
    The module zero-inits biases; we use small random biases here so the bias
    path of the kernel is actually exercised (biases are learnable anyway)."""
    shapes = []
    for i in range(num_kernels // 2):
        shapes.append((out_channels, in_channels, 1, 2 * i + 3))  # 1 x (2i+3)
        shapes.append((out_channels, in_channels, 2 * i + 3, 1))  # (2i+3) x 1
    shapes.append((out_channels, in_channels, 1, 1))
    weights, biases = [], []
    for s in shapes:
        key, kw_, kb_ = jax.random.split(key, 3)
        fan_out = s[0] * s[2] * s[3]
        std = (2.0 / fan_out) ** 0.5
        weights.append(std * jax.random.normal(kw_, s, dtype=jnp.float32))
        biases.append(0.1 * jax.random.normal(kb_, (out_channels,), dtype=jnp.float32))
    return weights, biases


# ------------------------------ pure-JAX reference ---------------------------
def ref_forward(x, weights, biases):
    outs = []
    for w, bb in zip(weights, biases):
        _, _, kh, kw = w.shape
        ph, pw = (kh - 1) // 2, (kw - 1) // 2
        y = jax.lax.conv_general_dilated(
            x, w, window_strides=(1, 1), padding=[(ph, ph), (pw, pw)],
            dimension_numbers=("NCHW", "OIHW", "NCHW"),
        ) + bb[None, :, None, None]
        outs.append(y)
    return jnp.mean(jnp.stack(outs, axis=-1), axis=-1)


if __name__ == "__main__":
    key = jax.random.PRNGKey(0)
    k_x, k_p = jax.random.split(key)

    N, Cin, Cout, H, W = 2, 4, 8, 16, 16
    x = jax.random.normal(k_x, (N, Cin, H, W), dtype=jnp.float32)
    weights, biases = init_params(k_p, Cin, Cout)

    out = jax.block_until_ready(inception_block_v2(x, weights, biases))
    ref = jax.block_until_ready(ref_forward(x, weights, biases))

    assert out.shape == (N, Cout, H, W)
    # bf16 MXU operands vs f32 conv reference -> loose-but-safe tolerance.
    max_err = float(jnp.max(jnp.abs(out - ref)))
    assert jnp.allclose(out, ref, atol=5e-2, rtol=5e-2), f"mismatch: max|d|={max_err}"

    print("KERNEL_OK")
</pallas_src>

<mosaic_0001>
module attributes {stable_mosaic.version = 11 : i64} {
  func.func @kernel(%arg0: i32, %arg1: i32, %arg2: memref<1x4x256xf32, #tpu.memory_space<vmem>>, %arg3: memref<8x208xbf16, #tpu.memory_space<vmem>>, %arg4: memref<8x1xf32, #tpu.memory_space<vmem>>, %arg5: memref<1x8x384xf32, #tpu.memory_space<vmem>>, %arg6: memref<4x552xbf16, #tpu.memory_space<vmem>>, %arg7: memref<208x384xbf16, #tpu.memory_space<vmem>>) attributes {dimension_semantics = [#tpu.dimension_semantics<parallel>, #tpu.dimension_semantics<arbitrary>], iteration_bounds = array<i64: 2, 1>, scalar_prefetch = 0 : i64, scratch_operands = 2 : i64, tpu.core_type = #tpu.core_type<tc>, window_params = [{transform_indices = @transform_0, window_bounds = array<i64: 1, 4, 256>}, {transform_indices = @transform_1, window_bounds = array<i64: 8, 208>}, {transform_indices = @transform_2, window_bounds = array<i64: 8, 1>}, {transform_indices = @transform_3, window_bounds = array<i64: 1, 8, 384>}]} {
    %cst = arith.constant 0.000000e+00 : bf16
    %0 = vector.broadcast %cst : bf16 to vector<4x75xbf16>
    %c0 = arith.constant 0 : index
    %c0_0 = arith.constant 0 : index
    %1 = vector.load %arg6[%c0, %c0_0] : memref<4x552xbf16, #tpu.memory_space<vmem>>, vector<4x75xbf16>
    tpu.vector_store %arg6[%c0, %c0_0], %0 {strides = array<i32>} : memref<4x552xbf16, #tpu.memory_space<vmem>>, vector<4x75xbf16>,
    %cst_1 = arith.constant 0.000000e+00 : bf16
    %2 = vector.broadcast %cst_1 : bf16 to vector<4x8xbf16>
    %c0_i32 = arith.constant 0 : i32
    %c3_i32 = arith.constant 3 : i32
    %3 = arith.addi %c0_i32, %c3_i32 : i32
    %c24_i32 = arith.constant 24 : i32
    %4 = arith.muli %3, %c24_i32 : i32
    %c3_i32_2 = arith.constant 3 : i32
    %5 = arith.addi %4, %c3_i32_2 : i32
    %c16_i32 = arith.constant 16 : i32
    %6 = arith.muli %c0_i32, %c16_i32 : i32
    %c0_3 = arith.constant 0 : index
    %c0_4 = arith.constant 0 : index
    %7 = arith.index_cast %6 : i32 to index
    %8 = vector.load %arg2[%c0_3, %c0_4, %7] : memref<1x4x256xf32, #tpu.memory_space<vmem>>, vector<1x4x16xf32>
    %9 = vector.shape_cast %8 : vector<1x4x16xf32> to vector<4x16xf32>
    %10 = arith.truncf %9 : vector<4x16xf32> to vector<4x16xbf16>
    %c0_5 = arith.constant 0 : index
    %11 = arith.index_cast %5 : i32 to index
    %12 = vector.load %arg6[%c0_5, %11] : memref<4x552xbf16, #tpu.memory_space<vmem>>, vector<4x16xbf16>
    tpu.vector_store %arg6[%c0_5, %11], %10 {strides = array<i32>} : memref<4x552xbf16, #tpu.memory_space<vmem>>, vector<4x16xbf16>,
    %c16_i32_6 = arith.constant 16 : i32
    %13 = arith.addi %5, %c16_i32_6 : i32
    %c0_7 = arith.constant 0 : index
    %14 = arith.index_cast %13 : i32 to index
    %15 = vector.load %arg6[%c0_7, %14] : memref<4x552xbf16, #tpu.memory_space<vmem>>, vector<4x8xbf16>
    tpu.vector_store %arg6[%c0_7, %14], %2 {strides = array<i32>} : memref<4x552xbf16, #tpu.memory_space<vmem>>, vector<4x8xbf16>,
    %c1_i32 = arith.constant 1 : i32
    %c3_i32_8 = arith.constant 3 : i32
    %16 = arith.addi %c1_i32, %c3_i32_8 : i32
    %c24_i32_9 = arith.constant 24 : i32
    %17 = arith.muli %16, %c24_i32_9 : i32
    %c3_i32_10 = arith.constant 3 : i32
    %18 = arith.addi %17, %c3_i32_10 : i32
    %c16_i32_11 = arith.constant 16 : i32
    %19 = arith.muli %c1_i32, %c16_i32_11 : i32
    %c0_12 = arith.constant 0 : index
    %c0_13 = arith.constant 0 : index
    %20 = arith.index_cast %19 : i32 to index
    %21 = vector.load %arg2[%c0_12, %c0_13, %20] : memref<1x4x256xf32, #tpu.memory_space<vmem>>, vector<1x4x16xf32>
    %22 = vector.shape_cast %21 : vector<1x4x16xf32> to vector<4x16xf32>
    %23 = arith.truncf %22 : vector<4x16xf32> to vector<4x16xbf16>
    %c0_14 = arith.constant 0 : index
    %24 = arith.index_cast %18 : i32 to index
    %25 = vector.load %arg6[%c0_14, %24] : memref<4x552xbf16, #tpu.memory_space<vmem>>, vector<4x16xbf16>
    tpu.vector_store %arg6[%c0_14, %24], %23 {strides = array<i32>} : memref<4x552xbf16, #tpu.memory_space<vmem>>, vector<4x16xbf16>,
    %c16_i32_15 = arith.constant 16 : i32
    %26 = arith.addi %18, %c16_i32_15 : i32
    %c0_16 = arith.constant 0 : index
    %27 = arith.index_cast %26 : i32 to index
    %28 = vector.load %arg6[%c0_16, %27] : memref<4x552xbf16, #tpu.memory_space<vmem>>, vector<4x8xbf16>
    tpu.vector_store %arg6[%c0_16, %27], %2 {strides = array<i32>} : memref<4x552xbf16, #tpu.memory_space<vmem>>, vector<4x8xbf16>,
    %c2_i32 = arith.constant 2 : i32
    %c3_i32_17 = arith.constant 3 : i32
    %29 = arith.addi %c2_i32, %c3_i32_17 : i32
    %c24_i32_18 = arith.constant 24 : i32
    %30 = arith.muli %29, %c24_i32_18 : i32
    %c3_i32_19 = arith.constant 3 : i32
    %31 = arith.addi %30, %c3_i32_19 : i32
    %c16_i32_20 = arith.constant 16 : i32
    %32 = arith.muli %c2_i32, %c16_i32_20 : i32
    %c0_21 = arith.constant 0 : index
    %c0_22 = arith.constant 0 : index
    %33 = arith.index_cast %32 : i32 to index
    %34 = vector.load %arg2[%c0_21, %c0_22, %33] : memref<1x4x256xf32, #tpu.memory_space<vmem>>, vector<1x4x16xf32>
    %35 = vector.shape_cast %34 : vector<1x4x16xf32> to vector<4x16xf32>
    %36 = arith.truncf %35 : vector<4x16xf32> to vector<4x16xbf16>
    %c0_23 = arith.constant 0 : index
    %37 = arith.index_cast %31 : i32 to index
    %38 = vector.load %arg6[%c0_23, %37] : memref<4x552xbf16, #tpu.memory_space<vmem>>, vector<4x16xbf16>
    tpu.vector_store %arg6[%c0_23, %37], %36 {strides = array<i32>} : memref<4x552xbf16, #tpu.memory_space<vmem>>, vector<4x16xbf16>,
    %c16_i32_24 = arith.constant 16 : i32
    %39 = arith.addi %31, %c16_i32_24 : i32
    %c0_25 = arith.constant 0 : index
    %40 = arith.index_cast %39 : i32 to index
    %41 = vector.load %arg6[%c0_25, %40] : memref<4x552xbf16, #tpu.memory_space<vmem>>, vector<4x8xbf16>
    tpu.vector_store %arg6[%c0_25, %40], %2 {strides = array<i32>} : memref<4x552xbf16, #tpu.memory_space<vmem>>, vector<4x8xbf16>,
    %c3_i32_26 = arith.constant 3 : i32
    %c3_i32_27 = arith.constant 3 : i32
    %42 = arith.addi %c3_i32_26, %c3_i32_27 : i32
    %c24_i32_28 = arith.constant 24 : i32
    %43 = arith.muli %42, %c24_i32_28 : i32
    %c3_i32_29 = arith.constant 3 : i32
    %44 = arith.addi %43, %c3_i32_29 : i32
    %c16_i32_30 = arith.constant 16 : i32
    %45 = arith.muli %c3_i32_26, %c16_i32_30 : i32
    %c0_31 = arith.constant 0 : index
    %c0_32 = arith.constant 0 : index
    %46 = arith.index_cast %45 : i32 to index
    %47 = vector.load %arg2[%c0_31, %c0_32, %46] : memref<1x4x256xf32, #tpu.memory_space<vmem>>, vector<1x4x16xf32>
    %48 = vector.shape_cast %47 : vector<1x4x16xf32> to vector<4x16xf32>
    %49 = arith.truncf %48 : vector<4x16xf32> to vector<4x16xbf16>
    %c0_33 = arith.constant 0 : index
    %50 = arith.index_cast %44 : i32 to index
    %51 = vector.load %arg6[%c0_33, %50] : memref<4x552xbf16, #tpu.memory_space<vmem>>, vector<4x16xbf16>
    tpu.vector_store %arg6[%c0_33, %50], %49 {strides = array<i32>} : memref<4x552xbf16, #tpu.memory_space<vmem>>, vector<4x16xbf16>,
    %c16_i32_34 = arith.constant 16 : i32
    %52 = arith.addi %44, %c16_i32_34 : i32
    %c0_35 = arith.constant 0 : index
    %53 = arith.index_cast %52 : i32 to index
    %54 = vector.load %arg6[%c0_35, %53] : memref<4x552xbf16, #tpu.memory_space<vmem>>, vector<4x8xbf16>
    tpu.vector_store %arg6[%c0_35, %53], %2 {strides = array<i32>} : memref<4x552xbf16, #tpu.memory_space<vmem>>, vector<4x8xbf16>,
    %c4_i32 = arith.constant 4 : i32
    %c3_i32_36 = arith.constant 3 : i32
    %55 = arith.addi %c4_i32, %c3_i32_36 : i32
    %c24_i32_37 = arith.constant 24 : i32
    %56 = arith.muli %55, %c24_i32_37 : i32
    %c3_i32_38 = arith.constant 3 : i32
    %57 = arith.addi %56, %c3_i32_38 : i32
    %c16_i32_39 = arith.constant 16 : i32
    %58 = arith.muli %c4_i32, %c16_i32_39 : i32
    %c0_40 = arith.constant 0 : index
    %c0_41 = arith.constant 0 : index
    %59 = arith.index_cast %58 : i32 to index
    %60 = vector.load %arg2[%c0_40, %c0_41, %59] : memref<1x4x256xf32, #tpu.memory_space<vmem>>, vector<1x4x16xf32>
    %61 = vector.shape_cast %60 : vector<1x4x16xf32> to vector<4x16xf32>
    %62 = arith.truncf %61 : vector<4x16xf32> to vector<4x16xbf16>
    %c0_42 = arith.constant 0 : index
    %63 = arith.index_cast %57 : i32 to index
    %64 = vector.load %arg6[%c0_42, %63] : memref<4x552xbf16, #tpu.memory_space<vmem>>, vector<4x16xbf16>
    tpu.vector_store %arg6[%c0_42, %63], %62 {strides = array<i32>} : memref<4x552xbf16, #tpu.memory_space<vmem>>, vector<4x16xbf16>,
    %c16_i32_43 = arith.constant 16 : i32
    %65 = arith.addi %57, %c16_i32_43 : i32
    %c0_44 = arith.constant 0 : index
    %66 = arith.index_cast %65 : i32 to index
    %67 = vector.load %arg6[%c0_44, %66] : memref<4x552xbf16, #tpu.memory_space<vmem>>, vector<4x8xbf16>
    tpu.vector_store %arg6[%c0_44, %66], %2 {strides = array<i32>} : memref<4x552xbf16, #tpu.memory_space<vmem>>, vector<4x8xbf16>,
    %c5_i32 = arith.constant 5 : i32
    %c3_i32_45 = arith.constant 3 : i32
    %68 = arith.addi %c5_i32, %c3_i32_45 : i32
    %c24_i32_46 = arith.constant 24 : i32
    %69 = arith.muli %68, %c24_i32_46 : i32
    %c3_i32_47 = arith.constant 3 : i32
    %70 = arith.addi %69, %c3_i32_47 : i32
    %c16_i32_48 = arith.constant 16 : i32
    %71 = arith.muli %c5_i32, %c16_i32_48 : i32
    %c0_49 = arith.constant 0 : index
    %c0_50 = arith.constant 0 : index
    %72 = arith.index_cast %71 : i32 to index
    %73 = vector.load %arg2[%c0_49, %c0_50, %72] : memref<1x4x256xf32, #tpu.memory_space<vmem>>, vector<1x4x16xf32>
    %74 = vector.shape_cast %73 : vector<1x4x16xf32> to vector<4x16xf32>
    %75 = arith.truncf %74 : vector<4x16xf32> to vector<4x16xbf16>
    %c0_51 = arith.constant 0 : index
    %76 = arith.index_cast %70 : i32 to index
    %77 = vector.load %arg6[%c0_51, %76] : memref<4x552xbf16, #tpu.memory_space<vmem>>, vector<4x16xbf16>
    tpu.vector_store %arg6[%c0_51, %76], %75 {strides = array<i32>} : memref<4x552xbf16, #tpu.memory_space<vmem>>, vector<4x16xbf16>,
    %c16_i32_52 = arith.constant 16 : i32
    %78 = arith.addi %70, %c16_i32_52 : i32
    %c0_53 = arith.constant 0 : index
    %79 = arith.index_cast %78 : i32 to index
    %80 = vector.load %arg6[%c0_53, %79] : memref<4x552xbf16, #tpu.memory_space<vmem>>, vector<4x8xbf16>
    tpu.vector_store %arg6[%c0_53, %79], %2 {strides = array<i32>} : memref<4x552xbf16, #tpu.memory_space<vmem>>, vector<4x8xbf16>,
    %c6_i32 = arith.constant 6 : i32
    %c3_i32_54 = arith.constant 3 : i32
    %81 = arith.addi %c6_i32, %c3_i32_54 : i32
    %c24_i32_55 = arith.constant 24 : i32
    %82 = arith.muli %81, %c24_i32_55 : i32
    %c3_i32_56 = arith.constant 3 : i32
    %83 = arith.addi %82, %c3_i32_56 : i32
    %c16_i32_57 = arith.constant 16 : i32
    %84 = arith.muli %c6_i32, %c16_i32_57 : i32
    %c0_58 = arith.constant 0 : index
    %c0_59 = arith.constant 0 : index
    %85 = arith.index_cast %84 : i32 to index
    %86 = vector.load %arg2[%c0_58, %c0_59, %85] : memref<1x4x256xf32, #tpu.memory_space<vmem>>, vector<1x4x16xf32>
    %87 = vector.shape_cast %86 : vector<1x4x16xf32> to vector<4x16xf32>
    %88 = arith.truncf %87 : vector<4x16xf32> to vector<4x16xbf16>
    %c0_60 = arith.constant 0 : index
    %89 = arith.index_cast %83 : i32 to index
    %90 = vector.load %arg6[%c0_60, %89] : memref<4x552xbf16, #tpu.memory_space<vmem>>, vector<4x16xbf16>
    tpu.vector_store %arg6[%c0_60, %89], %88 {strides = array<i32>} : memref<4x552xbf16, #tpu.memory_space<vmem>>, vector<4x16xbf16>,
    %c16_i32_61 = arith.constant 16 : i32
    %91 = arith.addi %83, %c16_i32_61 : i32
    %c0_62 = arith.constant 0 : index
    %92 = arith.index_cast %91 : i32 to index
    %93 = vector.load %arg6[%c0_62, %92] : memref<4x552xbf16, #tpu.memory_space<vmem>>, vector<4x8xbf16>
    tpu.vector_store %arg6[%c0_62, %92], %2 {strides = array<i32>} : memref<4x552xbf16, #tpu.memory_space<vmem>>, vector<4x8xbf16>,
    %c7_i32 = arith.constant 7 : i32
    %c3_i32_63 = arith.constant 3 : i32
    %94 = arith.addi %c7_i32, %c3_i32_63 : i32
    %c24_i32_64 = arith.constant 24 : i32
    %95 = arith.muli %94, %c24_i32_64 : i32
    %c3_i32_65 = arith.constant 3 : i32
    %96 = arith.addi %95, %c3_i32_65 : i32
    %c16_i32_66 = arith.constant 16 : i32
    %97 = arith.muli %c7_i32, %c16_i32_66 : i32
    %c0_67 = arith.constant 0 : index
    %c0_68 = arith.constant 0 : index
    %98 = arith.index_cast %97 : i32 to index
    %99 = vector.load %arg2[%c0_67, %c0_68, %98] : memref<1x4x256xf32, #tpu.memory_space<vmem>>, vector<1x4x16xf32>
    %100 = vector.shape_cast %99 : vector<1x4x16xf32> to vector<4x16xf32>
    %101 = arith.truncf %100 : vector<4x16xf32> to vector<4x16xbf16>
    %c0_69 = arith.constant 0 : index
    %102 = arith.index_cast %96 : i32 to index
    %103 = vector.load %arg6[%c0_69, %102] : memref<4x552xbf16, #tpu.memory_space<vmem>>, vector<4x16xbf16>
    tpu.vector_store %arg6[%c0_69, %102], %101 {strides = array<i32>} : memref<4x552xbf16, #tpu.memory_space<vmem>>, vector<4x16xbf16>,
    %c16_i32_70 = arith.constant 16 : i32
    %104 = arith.addi %96, %c16_i32_70 : i32
    %c0_71 = arith.constant 0 : index
    %105 = arith.index_cast %104 : i32 to index
    %106 = vector.load %arg6[%c0_71, %105] : memref<4x552xbf16, #tpu.memory_space<vmem>>, vector<4x8xbf16>
    tpu.vector_store %arg6[%c0_71, %105], %2 {strides = array<i32>} : memref<4x552xbf16, #tpu.memory_space<vmem>>, vector<4x8xbf16>,
    %c8_i32 = arith.constant 8 : i32
    %c3_i32_72 = arith.constant 3 : i32
    %107 = arith.addi %c8_i32, %c3_i32_72 : i32
    %c24_i32_73 = arith.constant 24 : i32
    %108 = arith.muli %107, %c24_i32_73 : i32
    %c3_i32_74 = arith.constant 3 : i32
    %109 = arith.addi %108, %c3_i32_74 : i32
    %c16_i32_75 = arith.constant 16 : i32
    %110 = arith.muli %c8_i32, %c16_i32_75 : i32
    %c0_76 = arith.constant 0 : index
    %c0_77 = arith.constant 0 : index
    %111 = arith.index_cast %110 : i32 to index
    %112 = vector.load %arg2[%c0_76, %c0_77, %111] : memref<1x4x256xf32, #tpu.memory_space<vmem>>, vector<1x4x16xf32>
    %113 = vector.shape_cast %112 : vector<1x4x16xf32> to vector<4x16xf32>
    %114 = arith.truncf %113 : vector<4x16xf32> to vector<4x16xbf16>
    %c0_78 = arith.constant 0 : index
    %115 = arith.index_cast %109 : i32 to index
    %116 = vector.load %arg6[%c0_78, %115] : memref<4x552xbf16, #tpu.memory_space<vmem>>, vector<4x16xbf16>
    tpu.vector_store %arg6[%c0_78, %115], %114 {strides = array<i32>} : memref<4x552xbf16, #tpu.memory_space<vmem>>, vector<4x16xbf16>,
    %c16_i32_79 = arith.constant 16 : i32
    %117 = arith.addi %109, %c16_i32_79 : i32
    %c0_80 = arith.constant 0 : index
    %118 = arith.index_cast %117 : i32 to index
    %119 = vector.load %arg6[%c0_80, %118] : memref<4x552xbf16, #tpu.memory_space<vmem>>, vector<4x8xbf16>
    tpu.vector_store %arg6[%c0_80, %118], %2 {strides = array<i32>} : memref<4x552xbf16, #tpu.memory_space<vmem>>, vector<4x8xbf16>,
    %c9_i32 = arith.constant 9 : i32
    %c3_i32_81 = arith.constant 3 : i32
    %120 = arith.addi %c9_i32, %c3_i32_81 : i32
    %c24_i32_82 = arith.constant 24 : i32
    %121 = arith.muli %120, %c24_i32_82 : i32
    %c3_i32_83 = arith.constant 3 : i32
    %122 = arith.addi %121, %c3_i32_83 : i32
    %c16_i32_84 = arith.constant 16 : i32
    %123 = arith.muli %c9_i32, %c16_i32_84 : i32
    %c0_85 = arith.constant 0 : index
    %c0_86 = arith.constant 0 : index
    %124 = arith.index_cast %123 : i32 to index
    %125 = vector.load %arg2[%c0_85, %c0_86, %124] : memref<1x4x256xf32, #tpu.memory_space<vmem>>, vector<1x4x16xf32>
    %126 = vector.shape_cast %125 : vector<1x4x16xf32> to vector<4x16xf32>
    %127 = arith.truncf %126 : vector<4x16xf32> to vector<4x16xbf16>
    %c0_87 = arith.constant 0 : index
    %128 = arith.index_cast %122 : i32 to index
    %129 = vector.load %arg6[%c0_87, %128] : memref<4x552xbf16, #tpu.memory_space<vmem>>, vector<4x16xbf16>
    tpu.vector_store %arg6[%c0_87, %128], %127 {strides = array<i32>} : memref<4x552xbf16, #tpu.memory_space<vmem>>, vector<4x16xbf16>,
    %c16_i32_88 = arith.constant 16 : i32
    %130 = arith.addi %122, %c16_i32_88 : i32
    %c0_89 = arith.constant 0 : index
    %131 = arith.index_cast %130 : i32 to index
    %132 = vector.load %arg6[%c0_89, %131] : memref<4x552xbf16, #tpu.memory_space<vmem>>, vector<4x8xbf16>
    tpu.vector_store %arg6[%c0_89, %131], %2 {strides = array<i32>} : memref<4x552xbf16, #tpu.memory_space<vmem>>, vector<4x8xbf16>,
    %c10_i32 = arith.constant 10 : i32
    %c3_i32_90 = arith.constant 3 : i32
    %133 = arith.addi %c10_i32, %c3_i32_90 : i32
    %c24_i32_91 = arith.constant 24 : i32
    %134 = arith.muli %133, %c24_i32_91 : i32
    %c3_i32_92 = arith.constant 3 : i32
    %135 = arith.addi %134, %c3_i32_92 : i32
    %c16_i32_93 = arith.constant 16 : i32
    %136 = arith.muli %c10_i32, %c16_i32_93 : i32
    %c0_94 = arith.constant 0 : index
    %c0_95 = arith.constant 0 : index
    %137 = arith.index_cast %136 : i32 to index
    %138 = vector.load %arg2[%c0_94, %c0_95, %137] : memref<1x4x256xf32, #tpu.memory_space<vmem>>, vector<1x4x16xf32>
    %139 = vector.shape_cast %138 : vector<1x4x16xf32> to vector<4x16xf32>
    %140 = arith.truncf %139 : vector<4x16xf32> to vector<4x16xbf16>
    %c0_96 = arith.constant 0 : index
    %141 = arith.index_cast %135 : i32 to index
    %142 = vector.load %arg6[%c0_96, %141] : memref<4x552xbf16, #tpu.memory_space<vmem>>, vector<4x16xbf16>
    tpu.vector_store %arg6[%c0_96, %141], %140 {strides = array<i32>} : memref<4x552xbf16, #tpu.memory_space<vmem>>, vector<4x16xbf16>,
    %c16_i32_97 = arith.constant 16 : i32
    %143 = arith.addi %135, %c16_i32_97 : i32
    %c0_98 = arith.constant 0 : index
    %144 = arith.index_cast %143 : i32 to index
    %145 = vector.load %arg6[%c0_98, %144] : memref<4x552xbf16, #tpu.memory_space<vmem>>, vector<4x8xbf16>
    tpu.vector_store %arg6[%c0_98, %144], %2 {strides = array<i32>} : memref<4x552xbf16, #tpu.memory_space<vmem>>, vector<4x8xbf16>,
    %c11_i32 = arith.constant 11 : i32
    %c3_i32_99 = arith.constant 3 : i32
    %146 = arith.addi %c11_i32, %c3_i32_99 : i32
    %c24_i32_100 = arith.constant 24 : i32
    %147 = arith.muli %146, %c24_i32_100 : i32
    %c3_i32_101 = arith.constant 3 : i32
    %148 = arith.addi %147, %c3_i32_101 : i32
    %c16_i32_102 = arith.constant 16 : i32
    %149 = arith.muli %c11_i32, %c16_i32_102 : i32
    %c0_103 = arith.constant 0 : index
    %c0_104 = arith.constant 0 : index
    %150 = arith.index_cast %149 : i32 to index
    %151 = vector.load %arg2[%c0_103, %c0_104, %150] : memref<1x4x256xf32, #tpu.memory_space<vmem>>, vector<1x4x16xf32>
    %152 = vector.shape_cast %151 : vector<1x4x16xf32> to vector<4x16xf32>
    %153 = arith.truncf %152 : vector<4x16xf32> to vector<4x16xbf16>
    %c0_105 = arith.constant 0 : index
    %154 = arith.index_cast %148 : i32 to index
    %155 = vector.load %arg6[%c0_105, %154] : memref<4x552xbf16, #tpu.memory_space<vmem>>, vector<4x16xbf16>
    tpu.vector_store %arg6[%c0_105, %154], %153 {strides = array<i32>} : memref<4x552xbf16, #tpu.memory_space<vmem>>, vector<4x16xbf16>,
    %c16_i32_106 = arith.constant 16 : i32
    %156 = arith.addi %148, %c16_i32_106 : i32
    %c0_107 = arith.constant 0 : index
    %157 = arith.index_cast %156 : i32 to index
    %158 = vector.load %arg6[%c0_107, %157] : memref<4x552xbf16, #tpu.memory_space<vmem>>, vector<4x8xbf16>
    tpu.vector_store %arg6[%c0_107, %157], %2 {strides = array<i32>} : memref<4x552xbf16, #tpu.memory_space<vmem>>, vector<4x8xbf16>,
    %c12_i32 = arith.constant 12 : i32
    %c3_i32_108 = arith.constant 3 : i32
    %159 = arith.addi %c12_i32, %c3_i32_108 : i32
    %c24_i32_109 = arith.constant 24 : i32
    %160 = arith.muli %159, %c24_i32_109 : i32
    %c3_i32_110 = arith.constant 3 : i32
    %161 = arith.addi %160, %c3_i32_110 : i32
    %c16_i32_111 = arith.constant 16 : i32
    %162 = arith.muli %c12_i32, %c16_i32_111 : i32
    %c0_112 = arith.constant 0 : index
    %c0_113 = arith.constant 0 : index
    %163 = arith.index_cast %162 : i32 to index
    %164 = vector.load %arg2[%c0_112, %c0_113, %163] : memref<1x4x256xf32, #tpu.memory_space<vmem>>, vector<1x4x16xf32>
    %165 = vector.shape_cast %164 : vector<1x4x16xf32> to vector<4x16xf32>
    %166 = arith.truncf %165 : vector<4x16xf32> to vector<4x16xbf16>
    %c0_114 = arith.constant 0 : index
    %167 = arith.index_cast %161 : i32 to index
    %168 = vector.load %arg6[%c0_114, %167] : memref<4x552xbf16, #tpu.memory_space<vmem>>, vector<4x16xbf16>
    tpu.vector_store %arg6[%c0_114, %167], %166 {strides = array<i32>} : memref<4x552xbf16, #tpu.memory_space<vmem>>, vector<4x16xbf16>,
    %c16_i32_115 = arith.constant 16 : i32
    %169 = arith.addi %161, %c16_i32_115 : i32
    %c0_116 = arith.constant 0 : index
    %170 = arith.index_cast %169 : i32 to index
    %171 = vector.load %arg6[%c0_116, %170] : memref<4x552xbf16, #tpu.memory_space<vmem>>, vector<4x8xbf16>
    tpu.vector_store %arg6[%c0_116, %170], %2 {strides = array<i32>} : memref<4x552xbf16, #tpu.memory_space<vmem>>, vector<4x8xbf16>,
    %c13_i32 = arith.constant 13 : i32
    %c3_i32_117 = arith.constant 3 : i32
    %172 = arith.addi %c13_i32, %c3_i32_117 : i32
    %c24_i32_118 = arith.constant 24 : i32
    %173 = arith.muli %172, %c24_i32_118 : i32
    %c3_i32_119 = arith.constant 3 : i32
    %174 = arith.addi %173, %c3_i32_119 : i32
    %c16_i32_120 = arith.constant 16 : i32
    %175 = arith.muli %c13_i32, %c16_i32_120 : i32
    %c0_121 = arith.constant 0 : index
    %c0_122 = arith.constant 0 : index
    %176 = arith.index_cast %175 : i32 to index
    %177 = vector.load %arg2[%c0_121, %c0_122, %176] : memref<1x4x256xf32, #tpu.memory_space<vmem>>, vector<1x4x16xf32>
    %178 = vector.shape_cast %177 : vector<1x4x16xf32> to vector<4x16xf32>
    %179 = arith.truncf %178 : vector<4x16xf32> to vector<4x16xbf16>
    %c0_123 = arith.constant 0 : index
    %180 = arith.index_cast %174 : i32 to index
    %181 = vector.load %arg6[%c0_123, %180] : memref<4x552xbf16, #tpu.memory_space<vmem>>, vector<4x16xbf16>
    tpu.vector_store %arg6[%c0_123, %180], %179 {strides = array<i32>} : memref<4x552xbf16, #tpu.memory_space<vmem>>, vector<4x16xbf16>,
    %c16_i32_124 = arith.constant 16 : i32
    %182 = arith.addi %174, %c16_i32_124 : i32
    %c0_125 = arith.constant 0 : index
    %183 = arith.index_cast %182 : i32 to index
    %184 = vector.load %arg6[%c0_125, %183] : memref<4x552xbf16, #tpu.memory_space<vmem>>, vector<4x8xbf16>
    tpu.vector_store %arg6[%c0_125, %183], %2 {strides = array<i32>} : memref<4x552xbf16, #tpu.memory_space<vmem>>, vector<4x8xbf16>,
    %c14_i32 = arith.constant 14 : i32
    %c3_i32_126 = arith.constant 3 : i32
    %185 = arith.addi %c14_i32, %c3_i32_126 : i32
    %c24_i32_127 = arith.constant 24 : i32
    %186 = arith.muli %185, %c24_i32_127 : i32
    %c3_i32_128 = arith.constant 3 : i32
    %187 = arith.addi %186, %c3_i32_128 : i32
    %c16_i32_129 = arith.constant 16 : i32
    %188 = arith.muli %c14_i32, %c16_i32_129 : i32
    %c0_130 = arith.constant 0 : index
    %c0_131 = arith.constant 0 : index
    %189 = arith.index_cast %188 : i32 to index
    %190 = vector.load %arg2[%c0_130, %c0_131, %189] : memref<1x4x256xf32, #tpu.memory_space<vmem>>, vector<1x4x16xf32>
    %191 = vector.shape_cast %190 : vector<1x4x16xf32> to vector<4x16xf32>
    %192 = arith.truncf %191 : vector<4x16xf32> to vector<4x16xbf16>
    %c0_132 = arith.constant 0 : index
    %193 = arith.index_cast %187 : i32 to index
    %194 = vector.load %arg6[%c0_132, %193] : memref<4x552xbf16, #tpu.memory_space<vmem>>, vector<4x16xbf16>
    tpu.vector_store %arg6[%c0_132, %193], %192 {strides = array<i32>} : memref<4x552xbf16, #tpu.memory_space<vmem>>, vector<4x16xbf16>,
    %c16_i32_133 = arith.constant 16 : i32
    %195 = arith.addi %187, %c16_i32_133 : i32
    %c0_134 = arith.constant 0 : index
    %196 = arith.index_cast %195 : i32 to index
    %197 = vector.load %arg6[%c0_134, %196] : memref<4x552xbf16, #tpu.memory_space<vmem>>, vector<4x8xbf16>
    tpu.vector_store %arg6[%c0_134, %196], %2 {strides = array<i32>} : memref<4x552xbf16, #tpu.memory_space<vmem>>, vector<4x8xbf16>,
    %c15_i32 = arith.constant 15 : i32
    %c3_i32_135 = arith.constant 3 : i32
    %198 = arith.addi %c15_i32, %c3_i32_135 : i32
    %c24_i32_136 = arith.constant 24 : i32
    %199 = arith.muli %198, %c24_i32_136 : i32
    %c3_i32_137 = arith.constant 3 : i32
    %200 = arith.addi %199, %c3_i32_137 : i32
    %c16_i32_138 = arith.constant 16 : i32
    %201 = arith.muli %c15_i32, %c16_i32_138 : i32
    %c0_139 = arith.constant 0 : index
    %c0_140 = arith.constant 0 : index
    %202 = arith.index_cast %201 : i32 to index
    %203 = vector.load %arg2[%c0_139, %c0_140, %202] : memref<1x4x256xf32, #tpu.memory_space<vmem>>, vector<1x4x16xf32>
    %204 = vector.shape_cast %203 : vector<1x4x16xf32> to vector<4x16xf32>
    %205 = arith.truncf %204 : vector<4x16xf32> to vector<4x16xbf16>
    %c0_141 = arith.constant 0 : index
    %206 = arith.index_cast %200 : i32 to index
    %207 = vector.load %arg6[%c0_141, %206] : memref<4x552xbf16, #tpu.memory_space<vmem>>, vector<4x16xbf16>
    tpu.vector_store %arg6[%c0_141, %206], %205 {strides = array<i32>} : memref<4x552xbf16, #tpu.memory_space<vmem>>, vector<4x16xbf16>,
    %c16_i32_142 = arith.constant 16 : i32
    %208 = arith.addi %200, %c16_i32_142 : i32
    %c0_143 = arith.constant 0 : index
    %209 = arith.index_cast %208 : i32 to index
    %210 = vector.load %arg6[%c0_143, %209] : memref<4x552xbf16, #tpu.memory_space<vmem>>, vector<4x8xbf16>
    tpu.vector_store %arg6[%c0_143, %209], %2 {strides = array<i32>} : memref<4x552xbf16, #tpu.memory_space<vmem>>, vector<4x8xbf16>,
    %c16_i32_144 = arith.constant 16 : i32
    %cst_145 = arith.constant 0.000000e+00 : bf16
    %211 = vector.broadcast %cst_145 : bf16 to vector<4x93xbf16>
    %c0_146 = arith.constant 0 : index
    %c459 = arith.constant 459 : index
    %212 = vector.load %arg6[%c0_146, %c459] : memref<4x552xbf16, #tpu.memory_space<vmem>>, vector<4x93xbf16>
    tpu.vector_store %arg6[%c0_146, %c459], %211 {strides = array<i32>} : memref<4x552xbf16, #tpu.memory_space<vmem>>, vector<4x93xbf16>,
    %cst_147 = arith.constant 0.000000e+00 : bf16
    %213 = vector.broadcast %cst_147 : bf16 to vector<12x384xbf16>
    %c4 = arith.constant 4 : index
    %c0_148 = arith.constant 0 : index
    %214 = vector.load %arg7[%c4, %c0_148] : memref<208x384xbf16, #tpu.memory_space<vmem>>, vector<12x384xbf16>
    tpu.vector_store %arg7[%c4, %c0_148], %213 {strides = array<i32>} : memref<208x384xbf16, #tpu.memory_space<vmem>>, vector<12x384xbf16>,
    %c20 = arith.constant 20 : index
    %c0_149 = arith.constant 0 : index
    %215 = vector.load %arg7[%c20, %c0_149] : memref<208x384xbf16, #tpu.memory_space<vmem>>, vector<12x384xbf16>
    tpu.vector_store %arg7[%c20, %c0_149], %213 {strides = array<i32>} : memref<208x384xbf16, #tpu.memory_space<vmem>>, vector<12x384xbf16>,
    %c36 = arith.constant 36 : index
    %c0_150 = arith.constant 0 : index
    %216 = vector.load %arg7[%c36, %c0_150] : memref<208x384xbf16, #tpu.memory_space<vmem>>, vector<12x384xbf16>
    tpu.vector_store %arg7[%c36, %c0_150], %213 {strides = array<i32>} : memref<208x384xbf16, #tpu.memory_space<vmem>>, vector<12x384xbf16>,
    %c52 = arith.constant 52 : index
    %c0_151 = arith.constant 0 : index
    %217 = vector.load %arg7[%c52, %c0_151] : memref<208x384xbf16, #tpu.memory_space<vmem>>, vector<12x384xbf16>
    tpu.vector_store %arg7[%c52, %c0_151], %213 {strides = array<i32>} : memref<208x384xbf16, #tpu.memory_space<vmem>>, vector<12x384xbf16>,
    %c68 = arith.constant 68 : index
    %c0_152 = arith.constant 0 : index
    %218 = vector.load %arg7[%c68, %c0_152] : memref<208x384xbf16, #tpu.memory_space<vmem>>, vector<12x384xbf16>
    tpu.vector_store %arg7[%c68, %c0_152], %213 {strides = array<i32>} : memref<208x384xbf16, #tpu.memory_space<vmem>>, vector<12x384xbf16>,
    %c84 = arith.constant 84 : index
    %c0_153 = arith.constant 0 : index
    %219 = vector.load %arg7[%c84, %c0_153] : memref<208x384xbf16, #tpu.memory_space<vmem>>, vector<12x384xbf16>
    tpu.vector_store %arg7[%c84, %c0_153], %213 {strides = array<i32>} : memref<208x384xbf16, #tpu.memory_space<vmem>>, vector<12x384xbf16>,
    %c100 = arith.constant 100 : index
    %c0_154 = arith.constant 0 : index
    %220 = vector.load %arg7[%c100, %c0_154] : memref<208x384xbf16, #tpu.memory_space<vmem>>, vector<12x384xbf16>
    tpu.vector_store %arg7[%c100, %c0_154], %213 {strides = array<i32>} : memref<208x384xbf16, #tpu.memory_space<vmem>>, vector<12x384xbf16>,
    %c116 = arith.constant 116 : index
    %c0_155 = arith.constant 0 : index
    %221 = vector.load %arg7[%c116, %c0_155] : memref<208x384xbf16, #tpu.memory_space<vmem>>, vector<12x384xbf16>
    tpu.vector_store %arg7[%c116, %c0_155], %213 {strides = array<i32>} : memref<208x384xbf16, #tpu.memory_space<vmem>>, vector<12x384xbf16>,
    %c132 = arith.constant 132 : index
    %c0_156 = arith.constant 0 : index
    %222 = vector.load %arg7[%c132, %c0_156] : memref<208x384xbf16, #tpu.memory_space<vmem>>, vector<12x384xbf16>
    tpu.vector_store %arg7[%c132, %c0_156], %213 {strides = array<i32>} : memref<208x384xbf16, #tpu.memory_space<vmem>>, vector<12x384xbf16>,
    %c148 = arith.constant 148 : index
    %c0_157 = arith.constant 0 : index
    %223 = vector.load %arg7[%c148, %c0_157] : memref<208x384xbf16, #tpu.memory_space<vmem>>, vector<12x384xbf16>
    tpu.vector_store %arg7[%c148, %c0_157], %213 {strides = array<i32>} : memref<208x384xbf16, #tpu.memory_space<vmem>>, vector<12x384xbf16>,
    %c164 = arith.constant 164 : index
    %c0_158 = arith.constant 0 : index
    %224 = vector.load %arg7[%c164, %c0_158] : memref<208x384xbf16, #tpu.memory_space<vmem>>, vector<12x384xbf16>
    tpu.vector_store %arg7[%c164, %c0_158], %213 {strides = array<i32>} : memref<208x384xbf16, #tpu.memory_space<vmem>>, vector<12x384xbf16>,
    %c180 = arith.constant 180 : index
    %c0_159 = arith.constant 0 : index
    %225 = vector.load %arg7[%c180, %c0_159] : memref<208x384xbf16, #tpu.memory_space<vmem>>, vector<12x384xbf16>
    tpu.vector_store %arg7[%c180, %c0_159], %213 {strides = array<i32>} : memref<208x384xbf16, #tpu.memory_space<vmem>>, vector<12x384xbf16>,
    %c196 = arith.constant 196 : index
    %c0_160 = arith.constant 0 : index
    %226 = vector.load %arg7[%c196, %c0_160] : memref<208x384xbf16, #tpu.memory_space<vmem>>, vector<12x384xbf16>
    tpu.vector_store %arg7[%c196, %c0_160], %213 {strides = array<i32>} : memref<208x384xbf16, #tpu.memory_space<vmem>>, vector<12x384xbf16>,
    %c0_161 = arith.constant 0 : index
    %c72 = arith.constant 72 : index
    %227 = vector.load %arg6[%c0_161, %c72] : memref<4x552xbf16, #tpu.memory_space<vmem>>, vector<4x384xbf16>
    %c0_162 = arith.constant 0 : index
    %c0_163 = arith.constant 0 : index
    %228 = vector.load %arg7[%c0_162, %c0_163] : memref<208x384xbf16, #tpu.memory_space<vmem>>, vector<4x384xbf16>
    tpu.vector_store %arg7[%c0_162, %c0_163], %227 {strides = array<i32>} : memref<208x384xbf16, #tpu.memory_space<vmem>>, vector<4x384xbf16>,
    %c0_164 = arith.constant 0 : index
    %c0_165 = arith.constant 0 : index
    %229 = vector.load %arg3[%c0_164, %c0_165] : memref<8x208xbf16, #tpu.memory_space<vmem>>, vector<8x16xbf16>
    %c0_166 = arith.constant 0 : index
    %c0_167 = arith.constant 0 : index
    %230 = vector.load %arg7[%c0_166, %c0_167] : memref<208x384xbf16, #tpu.memory_space<vmem>>, vector<16x384xbf16>
    %cst_168 = arith.constant dense<0.000000e+00> : vector<8x384xf32>
    %231 = tpu.matmul %229, %230, %cst_168 {dimension_numbers = #tpu.dot_dimension_numbers<[1], [0], [0], [1], [0, 0, 1, 1], [], []>} : vector<8x16xbf16>, vector<16x384xbf16>, vector<8x384xf32> -> vector<8x384xf32>
    %c0_169 = arith.constant 0 : index
    %c0_170 = arith.constant 0 : index
    %232 = vector.load %arg4[%c0_169, %c0_170] : memref<8x1xf32, #tpu.memory_space<vmem>>, vector<8x1xf32>
    %233 = vector.broadcast %232 : vector<8x1xf32> to vector<8x384xf32>
    %234 = arith.addf %231, %233 : vector<8x384xf32>
    %c0_171 = arith.constant 0 : index
    %c0_172 = arith.constant 0 : index
    %c0_173 = arith.constant 0 : index
    %235 = vector.load %arg5[%c0_171, %c0_172, %c0_173] : memref<1x8x384xf32, #tpu.memory_space<vmem>>, vector<1x8x384xf32>
    %236 = vector.shape_cast %235 : vector<1x8x384xf32> to vector<8x384xf32>
    %237 = vector.shape_cast %234 : vector<8x384xf32> to vector<1x8x384xf32>
    tpu.vector_store %arg5[%c0_171, %c0_172, %c0_173], %237 {strides = array<i32>} : memref<1x8x384xf32, #tpu.memory_space<vmem>>, vector<1x8x384xf32>,
    %c0_174 = arith.constant 0 : index
    %c73 = arith.constant 73 : index
    %238 = vector.load %arg6[%c0_174, %c73] : memref<4x552xbf16, #tpu.memory_space<vmem>>, vector<4x384xbf16>
    %c16 = arith.constant 16 : index
    %c0_175 = arith.constant 0 : index
    %239 = vector.load %arg7[%c16, %c0_175] : memref<208x384xbf16, #tpu.memory_space<vmem>>, vector<4x384xbf16>
    tpu.vector_store %arg7[%c16, %c0_175], %238 {strides = array<i32>} : memref<208x384xbf16, #tpu.memory_space<vmem>>, vector<4x384xbf16>,
    %c0_176 = arith.constant 0 : index
    %c16_177 = arith.constant 16 : index
    %240 = vector.load %arg3[%c0_176, %c16_177] : memref<8x208xbf16, #tpu.memory_space<vmem>>, vector<8x16xbf16>
    %c16_178 = arith.constant 16 : index
    %c0_179 = arith.constant 0 : index
    %241 = vector.load %arg7[%c16_178, %c0_179] : memref<208x384xbf16, #tpu.memory_space<vmem>>, vector<16x384xbf16>
    %cst_180 = arith.constant dense<0.000000e+00> : vector<8x384xf32>
    %242 = tpu.matmul %240, %241, %cst_180 {dimension_numbers = #tpu.dot_dimension_numbers<[1], [0], [0], [1], [0, 0, 1, 1], [], []>} : vector<8x16xbf16>, vector<16x384xbf16>, vector<8x384xf32> -> vector<8x384xf32>
    %c0_181 = arith.constant 0 : index
    %c0_182 = arith.constant 0 : index
    %c0_183 = arith.constant 0 : index
    %243 = vector.load %arg5[%c0_181, %c0_182, %c0_183] : memref<1x8x384xf32, #tpu.memory_space<vmem>>, vector<1x8x384xf32>
    %244 = vector.shape_cast %243 : vector<1x8x384xf32> to vector<8x384xf32>
    %245 = arith.addf %244, %242 : vector<8x384xf32>
    %c0_184 = arith.constant 0 : index
    %c0_185 = arith.constant 0 : index
    %c0_186 = arith.constant 0 : index
    %246 = vector.load %arg5[%c0_184, %c0_185, %c0_186] : memref<1x8x384xf32, #tpu.memory_space<vmem>>, vector<1x8x384xf32>
    %247 = vector.shape_cast %246 : vector<1x8x384xf32> to vector<8x384xf32>
    %248 = vector.shape_cast %245 : vector<8x384xf32> to vector<1x8x384xf32>
    tpu.vector_store %arg5[%c0_184, %c0_185, %c0_186], %248 {strides = array<i32>} : memref<1x8x384xf32, #tpu.memory_space<vmem>>, vector<1x8x384xf32>,
    %c0_187 = arith.constant 0 : index
    %c74 = arith.constant 74 : index
    %249 = vector.load %arg6[%c0_187, %c74] : memref<4x552xbf16, #tpu.memory_space<vmem>>, vector<4x384xbf16>
    %c32 = arith.constant 32 : index
    %c0_188 = arith.constant 0 : index
    %250 = vector.load %arg7[%c32, %c0_188] : memref<208x384xbf16, #tpu.memory_space<vmem>>, vector<4x384xbf16>
    tpu.vector_store %arg7[%c32, %c0_188], %249 {strides = array<i32>} : memref<208x384xbf16, #tpu.memory_space<vmem>>, vector<4x384xbf16>,
    %c0_189 = arith.constant 0 : index
    %c32_190 = arith.constant 32 : index
    %251 = vector.load %arg3[%c0_189, %c32_190] : memref<8x208xbf16, #tpu.memory_space<vmem>>, vector<8x16xbf16>
    %c32_191 = arith.constant 32 : index
    %c0_192 = arith.constant 0 : index
    %252 = vector.load %arg7[%c32_191, %c0_192] : memref<208x384xbf16, #tpu.memory_space<vmem>>, vector<16x384xbf16>
    %cst_193 = arith.constant dense<0.000000e+00> : vector<8x384xf32>
    %253 = tpu.matmul %251, %252, %cst_193 {dimension_numbers = #tpu.dot_dimension_numbers<[1], [0], [0], [1], [0, 0, 1, 1], [], []>} : vector<8x16xbf16>, vector<16x384xbf16>, vector<8x384xf32> -> vector<8x384xf32>
    %c0_194 = arith.constant 0 : index
    %c0_195 = arith.constant 0 : index
    %c0_196 = arith.constant 0 : index
    %254 = vector.load %arg5[%c0_194, %c0_195, %c0_196] : memref<1x8x384xf32, #tpu.memory_space<vmem>>, vector<1x8x384xf32>
    %255 = vector.shape_cast %254 : vector<1x8x384xf32> to vector<8x384xf32>
    %256 = arith.addf %255, %253 : vector<8x384xf32>
    %c0_197 = arith.constant 0 : index
    %c0_198 = arith.constant 0 : index
    %c0_199 = arith.constant 0 : index
    %257 = vector.load %arg5[%c0_197, %c0_198, %c0_199] : memref<1x8x384xf32, #tpu.memory_space<vmem>>, vector<1x8x384xf32>
    %258 = vector.shape_cast %257 : vector<1x8x384xf32> to vector<8x384xf32>
    %259 = vector.shape_cast %256 : vector<8x384xf32> to vector<1x8x384xf32>
    tpu.vector_store %arg5[%c0_197, %c0_198, %c0_199], %259 {strides = array<i32>} : memref<1x8x384xf32, #tpu.memory_space<vmem>>, vector<1x8x384xf32>,
    %c0_200 = arith.constant 0 : index
    %c75 = arith.constant 75 : index
    %260 = vector.load %arg6[%c0_200, %c75] : memref<4x552xbf16, #tpu.memory_space<vmem>>, vector<4x384xbf16>
    %c48 = arith.constant 48 : index
    %c0_201 = arith.constant 0 : index
    %261 = vector.load %arg7[%c48, %c0_201] : memref<208x384xbf16, #tpu.memory_space<vmem>>, vector<4x384xbf16>
    tpu.vector_store %arg7[%c48, %c0_201], %260 {strides = array<i32>} : memref<208x384xbf16, #tpu.memory_space<vmem>>, vector<4x384xbf16>,
    %c0_202 = arith.constant 0 : index
    %c48_203 = arith.constant 48 : index
    %262 = vector.load %arg3[%c0_202, %c48_203] : memref<8x208xbf16, #tpu.memory_space<vmem>>, vector<8x16xbf16>
    %c48_204 = arith.constant 48 : index
    %c0_205 = arith.constant 0 : index
    %263 = vector.load %arg7[%c48_204, %c0_205] : memref<208x384xbf16, #tpu.memory_space<vmem>>, vector<16x384xbf16>
    %cst_206 = arith.constant dense<0.000000e+00> : vector<8x384xf32>
    %264 = tpu.matmul %262, %263, %cst_206 {dimension_numbers = #tpu.dot_dimension_numbers<[1], [0], [0], [1], [0, 0, 1, 1], [], []>} : vector<8x16xbf16>, vector<16x384xbf16>, vector<8x384xf32> -> vector<8x384xf32>
    %c0_207 = arith.constant 0 : index
    %c0_208 = arith.constant 0 : index
    %c0_209 = arith.constant 0 : index
    %265 = vector.load %arg5[%c0_207, %c0_208, %c0_209] : memref<1x8x384xf32, #tpu.memory_space<vmem>>, vector<1x8x384xf32>
    %266 = vector.shape_cast %265 : vector<1x8x384xf32> to vector<8x384xf32>
    %267 = arith.addf %266, %264 : vector<8x384xf32>
    %c0_210 = arith.constant 0 : index
    %c0_211 = arith.constant 0 : index
    %c0_212 = arith.constant 0 : index
    %268 = vector.load %arg5[%c0_210, %c0_211, %c0_212] : memref<1x8x384xf32, #tpu.memory_space<vmem>>, vector<1x8x384xf32>
    %269 = vector.shape_cast %268 : vector<1x8x384xf32> to vector<8x384xf32>
    %270 = vector.shape_cast %267 : vector<8x384xf32> to vector<1x8x384xf32>
    tpu.vector_store %arg5[%c0_210, %c0_211, %c0_212], %270 {strides = array<i32>} : memref<1x8x384xf32, #tpu.memory_space<vmem>>, vector<1x8x384xf32>,
    %c0_213 = arith.constant 0 : index
    %c76 = arith.constant 76 : index
    %271 = vector.load %arg6[%c0_213, %c76] : memref<4x552xbf16, #tpu.memory_space<vmem>>, vector<4x384xbf16>
    %c64 = arith.constant 64 : index
    %c0_214 = arith.constant 0 : index
    %272 = vector.load %arg7[%c64, %c0_214] : memref<208x384xbf16, #tpu.memory_space<vmem>>, vector<4x384xbf16>
    tpu.vector_store %arg7[%c64, %c0_214], %271 {strides = array<i32>} : memref<208x384xbf16, #tpu.memory_space<vmem>>, vector<4x384xbf16>,
    %c0_215 = arith.constant 0 : index
    %c64_216 = arith.constant 64 : index
    %273 = vector.load %arg3[%c0_215, %c64_216] : memref<8x208xbf16, #tpu.memory_space<vmem>>, vector<8x16xbf16>
    %c64_217 = arith.constant 64 : index
    %c0_218 = arith.constant 0 : index
    %274 = vector.load %arg7[%c64_217, %c0_218] : memref<208x384xbf16, #tpu.memory_space<vmem>>, vector<16x384xbf16>
    %cst_219 = arith.constant dense<0.000000e+00> : vector<8x384xf32>
    %275 = tpu.matmul %273, %274, %cst_219 {dimension_numbers = #tpu.dot_dimension_numbers<[1], [0], [0], [1], [0, 0, 1, 1], [], []>} : vector<8x16xbf16>, vector<16x384xbf16>, vector<8x384xf32> -> vector<8x384xf32>
    %c0_220 = arith.constant 0 : index
    %c0_221 = arith.constant 0 : index
    %c0_222 = arith.constant 0 : index
    %276 = vector.load %arg5[%c0_220, %c0_221, %c0_222] : memref<1x8x384xf32, #tpu.memory_space<vmem>>, vector<1x8x384xf32>
    %277 = vector.shape_cast %276 : vector<1x8x384xf32> to vector<8x384xf32>
    %278 = arith.addf %277, %275 : vector<8x384xf32>
    %c0_223 = arith.constant 0 : index
    %c0_224 = arith.constant 0 : index
    %c0_225 = arith.constant 0 : index
    %279 = vector.load %arg5[%c0_223, %c0_224, %c0_225] : memref<1x8x384xf32, #tpu.memory_space<vmem>>, vector<1x8x384xf32>
    %280 = vector.shape_cast %279 : vector<1x8x384xf32> to vector<8x384xf32>
    %281 = vector.shape_cast %278 : vector<8x384xf32> to vector<1x8x384xf32>
    tpu.vector_store %arg5[%c0_223, %c0_224, %c0_225], %281 {strides = array<i32>} : memref<1x8x384xf32, #tpu.memory_space<vmem>>, vector<1x8x384xf32>,
    %c0_226 = arith.constant 0 : index
    %c77 = arith.constant 77 : index
    %282 = vector.load %arg6[%c0_226, %c77] : memref<4x552xbf16, #tpu.memory_space<vmem>>, vector<4x384xbf16>
    %c80 = arith.constant 80 : index
    %c0_227 = arith.constant 0 : index
    %283 = vector.load %arg7[%c80, %c0_227] : memref<208x384xbf16, #tpu.memory_space<vmem>>, vector<4x384xbf16>
    tpu.vector_store %arg7[%c80, %c0_227], %282 {strides = array<i32>} : memref<208x384xbf16, #tpu.memory_space<vmem>>, vector<4x384xbf16>,
    %c0_228 = arith.constant 0 : index
    %c80_229 = arith.constant 80 : index
    %284 = vector.load %arg3[%c0_228, %c80_229] : memref<8x208xbf16, #tpu.memory_space<vmem>>, vector<8x16xbf16>
    %c80_230 = arith.constant 80 : index
    %c0_231 = arith.constant 0 : index
    %285 = vector.load %arg7[%c80_230, %c0_231] : memref<208x384xbf16, #tpu.memory_space<vmem>>, vector<16x384xbf16>
    %cst_232 = arith.constant dense<0.000000e+00> : vector<8x384xf32>
    %286 = tpu.matmul %284, %285, %cst_232 {dimension_numbers = #tpu.dot_dimension_numbers<[1], [0], [0], [1], [0, 0, 1, 1], [], []>} : vector<8x16xbf16>, vector<16x384xbf16>, vector<8x384xf32> -> vector<8x384xf32>
    %c0_233 = arith.constant 0 : index
    %c0_234 = arith.constant 0 : index
    %c0_235 = arith.constant 0 : index
    %287 = vector.load %arg5[%c0_233, %c0_234, %c0_235] : memref<1x8x384xf32, #tpu.memory_space<vmem>>, vector<1x8x384xf32>
    %288 = vector.shape_cast %287 : vector<1x8x384xf32> to vector<8x384xf32>
    %289 = arith.addf %288, %286 : vector<8x384xf32>
    %c0_236 = arith.constant 0 : index
    %c0_237 = arith.constant 0 : index
    %c0_238 = arith.constant 0 : index
    %290 = vector.load %arg5[%c0_236, %c0_237, %c0_238] : memref<1x8x384xf32, #tpu.memory_space<vmem>>, vector<1x8x384xf32>
    %291 = vector.shape_cast %290 : vector<1x8x384xf32> to vector<8x384xf32>
    %292 = vector.shape_cast %289 : vector<8x384xf32> to vector<1x8x384xf32>
    tpu.vector_store %arg5[%c0_236, %c0_237, %c0_238], %292 {strides = array<i32>} : memref<1x8x384xf32, #tpu.memory_space<vmem>>, vector<1x8x384xf32>,
    %c0_239 = arith.constant 0 : index
    %c78 = arith.constant 78 : index
    %293 = vector.load %arg6[%c0_239, %c78] : memref<4x552xbf16, #tpu.memory_space<vmem>>, vector<4x384xbf16>
    %c96 = arith.constant 96 : index
    %c0_240 = arith.constant 0 : index
    %294 = vector.load %arg7[%c96, %c0_240] : memref<208x384xbf16, #tpu.memory_space<vmem>>, vector<4x384xbf16>
    tpu.vector_store %arg7[%c96, %c0_240], %293 {strides = array<i32>} : memref<208x384xbf16, #tpu.memory_space<vmem>>, vector<4x384xbf16>,
    %c0_241 = arith.constant 0 : index
    %c96_242 = arith.constant 96 : index
    %295 = vector.load %arg3[%c0_241, %c96_242] : memref<8x208xbf16, #tpu.memory_space<vmem>>, vector<8x16xbf16>
    %c96_243 = arith.constant 96 : index
    %c0_244 = arith.constant 0 : index
    %296 = vector.load %arg7[%c96_243, %c0_244] : memref<208x384xbf16, #tpu.memory_space<vmem>>, vector<16x384xbf16>
    %cst_245 = arith.constant dense<0.000000e+00> : vector<8x384xf32>
    %297 = tpu.matmul %295, %296, %cst_245 {dimension_numbers = #tpu.dot_dimension_numbers<[1], [0], [0], [1], [0, 0, 1, 1], [], []>} : vector<8x16xbf16>, vector<16x384xbf16>, vector<8x384xf32> -> vector<8x384xf32>
    %c0_246 = arith.constant 0 : index
    %c0_247 = arith.constant 0 : index
    %c0_248 = arith.constant 0 : index
    %298 = vector.load %arg5[%c0_246, %c0_247, %c0_248] : memref<1x8x384xf32, #tpu.memory_space<vmem>>, vector<1x8x384xf32>
    %299 = vector.shape_cast %298 : vector<1x8x384xf32> to vector<8x384xf32>
    %300 = arith.addf %299, %297 : vector<8x384xf32>
    %c0_249 = arith.constant 0 : index
    %c0_250 = arith.constant 0 : index
    %c0_251 = arith.constant 0 : index
    %301 = vector.load %arg5[%c0_249, %c0_250, %c0_251] : memref<1x8x384xf32, #tpu.memory_space<vmem>>, vector<1x8x384xf32>
    %302 = vector.shape_cast %301 : vector<1x8x384xf32> to vector<8x384xf32>
    %303 = vector.shape_cast %300 : vector<8x384xf32> to vector<1x8x384xf32>
    tpu.vector_store %arg5[%c0_249, %c0_250, %c0_251], %303 {strides = array<i32>} : memref<1x8x384xf32, #tpu.memory_space<vmem>>, vector<1x8x384xf32>,
    %c0_252 = arith.constant 0 : index
    %c3 = arith.constant 3 : index
    %304 = vector.load %arg6[%c0_252, %c3] : memref<4x552xbf16, #tpu.memory_space<vmem>>, vector<4x384xbf16>
    %c112 = arith.constant 112 : index
    %c0_253 = arith.constant 0 : index
    %305 = vector.load %arg7[%c112, %c0_253] : memref<208x384xbf16, #tpu.memory_space<vmem>>, vector<4x384xbf16>
    tpu.vector_store %arg7[%c112, %c0_253], %304 {strides = array<i32>} : memref<208x384xbf16, #tpu.memory_space<vmem>>, vector<4x384xbf16>,
    %c0_254 = arith.constant 0 : index
    %c112_255 = arith.constant 112 : index
    %306 = vector.load %arg3[%c0_254, %c112_255] : memref<8x208xbf16, #tpu.memory_space<vmem>>, vector<8x16xbf16>
    %c112_256 = arith.constant 112 : index
    %c0_257 = arith.constant 0 : index
    %307 = vector.load %arg7[%c112_256, %c0_257] : memref<208x384xbf16, #tpu.memory_space<vmem>>, vector<16x384xbf16>
    %cst_258 = arith.constant dense<0.000000e+00> : vector<8x384xf32>
    %308 = tpu.matmul %306, %307, %cst_258 {dimension_numbers = #tpu.dot_dimension_numbers<[1], [0], [0], [1], [0, 0, 1, 1], [], []>} : vector<8x16xbf16>, vector<16x384xbf16>, vector<8x384xf32> -> vector<8x384xf32>
    %c0_259 = arith.constant 0 : index
    %c0_260 = arith.constant 0 : index
    %c0_261 = arith.constant 0 : index
    %309 = vector.load %arg5[%c0_259, %c0_260, %c0_261] : memref<1x8x384xf32, #tpu.memory_space<vmem>>, vector<1x8x384xf32>
    %310 = vector.shape_cast %309 : vector<1x8x384xf32> to vector<8x384xf32>
    %311 = arith.addf %310, %308 : vector<8x384xf32>
    %c0_262 = arith.constant 0 : index
    %c0_263 = arith.constant 0 : index
    %c0_264 = arith.constant 0 : index
    %312 = vector.load %arg5[%c0_262, %c0_263, %c0_264] : memref<1x8x384xf32, #tpu.memory_space<vmem>>, vector<1x8x384xf32>
    %313 = vector.shape_cast %312 : vector<1x8x384xf32> to vector<8x384xf32>
    %314 = vector.shape_cast %311 : vector<8x384xf32> to vector<1x8x384xf32>
    tpu.vector_store %arg5[%c0_262, %c0_263, %c0_264], %314 {strides = array<i32>} : memref<1x8x384xf32, #tpu.memory_space<vmem>>, vector<1x8x384xf32>,
    %c0_265 = arith.constant 0 : index
    %c27 = arith.constant 27 : index
    %315 = vector.load %arg6[%c0_265, %c27] : memref<4x552xbf16, #tpu.memory_space<vmem>>, vector<4x384xbf16>
    %c128 = arith.constant 128 : index
    %c0_266 = arith.constant 0 : index
    %316 = vector.load %arg7[%c128, %c0_266] : memref<208x384xbf16, #tpu.memory_space<vmem>>, vector<4x384xbf16>
    tpu.vector_store %arg7[%c128, %c0_266], %315 {strides = array<i32>} : memref<208x384xbf16, #tpu.memory_space<vmem>>, vector<4x384xbf16>,
    %c0_267 = arith.constant 0 : index
    %c128_268 = arith.constant 128 : index
    %317 = vector.load %arg3[%c0_267, %c128_268] : memref<8x208xbf16, #tpu.memory_space<vmem>>, vector<8x16xbf16>
    %c128_269 = arith.constant 128 : index
    %c0_270 = arith.constant 0 : index
    %318 = vector.load %arg7[%c128_269, %c0_270] : memref<208x384xbf16, #tpu.memory_space<vmem>>, vector<16x384xbf16>
    %cst_271 = arith.constant dense<0.000000e+00> : vector<8x384xf32>
    %319 = tpu.matmul %317, %318, %cst_271 {dimension_numbers = #tpu.dot_dimension_numbers<[1], [0], [0], [1], [0, 0, 1, 1], [], []>} : vector<8x16xbf16>, vector<16x384xbf16>, vector<8x384xf32> -> vector<8x384xf32>
    %c0_272 = arith.constant 0 : index
    %c0_273 = arith.constant 0 : index
    %c0_274 = arith.constant 0 : index
    %320 = vector.load %arg5[%c0_272, %c0_273, %c0_274] : memref<1x8x384xf32, #tpu.memory_space<vmem>>, vector<1x8x384xf32>
    %321 = vector.shape_cast %320 : vector<1x8x384xf32> to vector<8x384xf32>
    %322 = arith.addf %321, %319 : vector<8x384xf32>
    %c0_275 = arith.constant 0 : index
    %c0_276 = arith.constant 0 : index
    %c0_277 = arith.constant 0 : index
    %323 = vector.load %arg5[%c0_275, %c0_276, %c0_277] : memref<1x8x384xf32, #tpu.memory_space<vmem>>, vector<1x8x384xf32>
    %324 = vector.shape_cast %323 : vector<1x8x384xf32> to vector<8x384xf32>
    %325 = vector.shape_cast %322 : vector<8x384xf32> to vector<1x8x384xf32>
    tpu.vector_store %arg5[%c0_275, %c0_276, %c0_277], %325 {strides = array<i32>} : memref<1x8x384xf32, #tpu.memory_space<vmem>>, vector<1x8x384xf32>,
    %c0_278 = arith.constant 0 : index
    %c51 = arith.constant 51 : index
    %326 = vector.load %arg6[%c0_278, %c51] : memref<4x552xbf16, #tpu.memory_space<vmem>>, vector<4x384xbf16>
    %c144 = arith.constant 144 : index
    %c0_279 = arith.constant 0 : index
    %327 = vector.load %arg7[%c144, %c0_279] : memref<208x384xbf16, #tpu.memory_space<vmem>>, vector<4x384xbf16>
    tpu.vector_store %arg7[%c144, %c0_279], %326 {strides = array<i32>} : memref<208x384xbf16, #tpu.memory_space<vmem>>, vector<4x384xbf16>,
    %c0_280 = arith.constant 0 : index
    %c144_281 = arith.constant 144 : index
    %328 = vector.load %arg3[%c0_280, %c144_281] : memref<8x208xbf16, #tpu.memory_space<vmem>>, vector<8x16xbf16>
    %c144_282 = arith.constant 144 : index
    %c0_283 = arith.constant 0 : index
    %329 = vector.load %arg7[%c144_282, %c0_283] : memref<208x384xbf16, #tpu.memory_space<vmem>>, vector<16x384xbf16>
    %cst_284 = arith.constant dense<0.000000e+00> : vector<8x384xf32>
    %330 = tpu.matmul %328, %329, %cst_284 {dimension_numbers = #tpu.dot_dimension_numbers<[1], [0], [0], [1], [0, 0, 1, 1], [], []>} : vector<8x16xbf16>, vector<16x384xbf16>, vector<8x384xf32> -> vector<8x384xf32>
    %c0_285 = arith.constant 0 : index
    %c0_286 = arith.constant 0 : index
    %c0_287 = arith.constant 0 : index
    %331 = vector.load %arg5[%c0_285, %c0_286, %c0_287] : memref<1x8x384xf32, #tpu.memory_space<vmem>>, vector<1x8x384xf32>
    %332 = vector.shape_cast %331 : vector<1x8x384xf32> to vector<8x384xf32>
    %333 = arith.addf %332, %330 : vector<8x384xf32>
    %c0_288 = arith.constant 0 : index
    %c0_289 = arith.constant 0 : index
    %c0_290 = arith.constant 0 : index
    %334 = vector.load %arg5[%c0_288, %c0_289, %c0_290] : memref<1x8x384xf32, #tpu.memory_space<vmem>>, vector<1x8x384xf32>
    %335 = vector.shape_cast %334 : vector<1x8x384xf32> to vector<8x384xf32>
    %336 = vector.shape_cast %333 : vector<8x384xf32> to vector<1x8x384xf32>
    tpu.vector_store %arg5[%c0_288, %c0_289, %c0_290], %336 {strides = array<i32>} : memref<1x8x384xf32, #tpu.memory_space<vmem>>, vector<1x8x384xf32>,
    %c0_291 = arith.constant 0 : index
    %c99 = arith.constant 99 : index
    %337 = vector.load %arg6[%c0_291, %c99] : memref<4x552xbf16, #tpu.memory_space<vmem>>, vector<4x384xbf16>
    %c160 = arith.constant 160 : index
    %c0_292 = arith.constant 0 : index
    %338 = vector.load %arg7[%c160, %c0_292] : memref<208x384xbf16, #tpu.memory_space<vmem>>, vector<4x384xbf16>
    tpu.vector_store %arg7[%c160, %c0_292], %337 {strides = array<i32>} : memref<208x384xbf16, #tpu.memory_space<vmem>>, vector<4x384xbf16>,
    %c0_293 = arith.constant 0 : index
    %c160_294 = arith.constant 160 : index
    %339 = vector.load %arg3[%c0_293, %c160_294] : memref<8x208xbf16, #tpu.memory_space<vmem>>, vector<8x16xbf16>
    %c160_295 = arith.constant 160 : index
    %c0_296 = arith.constant 0 : index
    %340 = vector.load %arg7[%c160_295, %c0_296] : memref<208x384xbf16, #tpu.memory_space<vmem>>, vector<16x384xbf16>
    %cst_297 = arith.constant dense<0.000000e+00> : vector<8x384xf32>
    %341 = tpu.matmul %339, %340, %cst_297 {dimension_numbers = #tpu.dot_dimension_numbers<[1], [0], [0], [1], [0, 0, 1, 1], [], []>} : vector<8x16xbf16>, vector<16x384xbf16>, vector<8x384xf32> -> vector<8x384xf32>
    %c0_298 = arith.constant 0 : index
    %c0_299 = arith.constant 0 : index
    %c0_300 = arith.constant 0 : index
    %342 = vector.load %arg5[%c0_298, %c0_299, %c0_300] : memref<1x8x384xf32, #tpu.memory_space<vmem>>, vector<1x8x384xf32>
    %343 = vector.shape_cast %342 : vector<1x8x384xf32> to vector<8x384xf32>
    %344 = arith.addf %343, %341 : vector<8x384xf32>
    %c0_301 = arith.constant 0 : index
    %c0_302 = arith.constant 0 : index
    %c0_303 = arith.constant 0 : index
    %345 = vector.load %arg5[%c0_301, %c0_302, %c0_303] : memref<1x8x384xf32, #tpu.memory_space<vmem>>, vector<1x8x384xf32>
    %346 = vector.shape_cast %345 : vector<1x8x384xf32> to vector<8x384xf32>
    %347 = vector.shape_cast %344 : vector<8x384xf32> to vector<1x8x384xf32>
    tpu.vector_store %arg5[%c0_301, %c0_302, %c0_303], %347 {strides = array<i32>} : memref<1x8x384xf32, #tpu.memory_space<vmem>>, vector<1x8x384xf32>,
    %c0_304 = arith.constant 0 : index
    %c123 = arith.constant 123 : index
    %348 = vector.load %arg6[%c0_304, %c123] : memref<4x552xbf16, #tpu.memory_space<vmem>>, vector<4x384xbf16>
    %c176 = arith.constant 176 : index
    %c0_305 = arith.constant 0 : index
    %349 = vector.load %arg7[%c176, %c0_305] : memref<208x384xbf16, #tpu.memory_space<vmem>>, vector<4x384xbf16>
    tpu.vector_store %arg7[%c176, %c0_305], %348 {strides = array<i32>} : memref<208x384xbf16, #tpu.memory_space<vmem>>, vector<4x384xbf16>,
    %c0_306 = arith.constant 0 : index
    %c176_307 = arith.constant 176 : index
    %350 = vector.load %arg3[%c0_306, %c176_307] : memref<8x208xbf16, #tpu.memory_space<vmem>>, vector<8x16xbf16>
    %c176_308 = arith.constant 176 : index
    %c0_309 = arith.constant 0 : index
    %351 = vector.load %arg7[%c176_308, %c0_309] : memref<208x384xbf16, #tpu.memory_space<vmem>>, vector<16x384xbf16>
    %cst_310 = arith.constant dense<0.000000e+00> : vector<8x384xf32>
    %352 = tpu.matmul %350, %351, %cst_310 {dimension_numbers = #tpu.dot_dimension_numbers<[1], [0], [0], [1], [0, 0, 1, 1], [], []>} : vector<8x16xbf16>, vector<16x384xbf16>, vector<8x384xf32> -> vector<8x384xf32>
    %c0_311 = arith.constant 0 : index
    %c0_312 = arith.constant 0 : index
    %c0_313 = arith.constant 0 : index
    %353 = vector.load %arg5[%c0_311, %c0_312, %c0_313] : memref<1x8x384xf32, #tpu.memory_space<vmem>>, vector<1x8x384xf32>
    %354 = vector.shape_cast %353 : vector<1x8x384xf32> to vector<8x384xf32>
    %355 = arith.addf %354, %352 : vector<8x384xf32>
    %c0_314 = arith.constant 0 : index
    %c0_315 = arith.constant 0 : index
    %c0_316 = arith.constant 0 : index
    %356 = vector.load %arg5[%c0_314, %c0_315, %c0_316] : memref<1x8x384xf32, #tpu.memory_space<vmem>>, vector<1x8x384xf32>
    %357 = vector.shape_cast %356 : vector<1x8x384xf32> to vector<8x384xf32>
    %358 = vector.shape_cast %355 : vector<8x384xf32> to vector<1x8x384xf32>
    tpu.vector_store %arg5[%c0_314, %c0_315, %c0_316], %358 {strides = array<i32>} : memref<1x8x384xf32, #tpu.memory_space<vmem>>, vector<1x8x384xf32>,
    %c0_317 = arith.constant 0 : index
    %c147 = arith.constant 147 : index
    %359 = vector.load %arg6[%c0_317, %c147] : memref<4x552xbf16, #tpu.memory_space<vmem>>, vector<4x384xbf16>
    %c192 = arith.constant 192 : index
    %c0_318 = arith.constant 0 : index
    %360 = vector.load %arg7[%c192, %c0_318] : memref<208x384xbf16, #tpu.memory_space<vmem>>, vector<4x384xbf16>
    tpu.vector_store %arg7[%c192, %c0_318], %359 {strides = array<i32>} : memref<208x384xbf16, #tpu.memory_space<vmem>>, vector<4x384xbf16>,
    %c0_319 = arith.constant 0 : index
    %c192_320 = arith.constant 192 : index
    %361 = vector.load %arg3[%c0_319, %c192_320] : memref<8x208xbf16, #tpu.memory_space<vmem>>, vector<8x16xbf16>
    %c192_321 = arith.constant 192 : index
    %c0_322 = arith.constant 0 : index
    %362 = vector.load %arg7[%c192_321, %c0_322] : memref<208x384xbf16, #tpu.memory_space<vmem>>, vector<16x384xbf16>
    %cst_323 = arith.constant dense<0.000000e+00> : vector<8x384xf32>
    %363 = tpu.matmul %361, %362, %cst_323 {dimension_numbers = #tpu.dot_dimension_numbers<[1], [0], [0], [1], [0, 0, 1, 1], [], []>} : vector<8x16xbf16>, vector<16x384xbf16>, vector<8x384xf32> -> vector<8x384xf32>
    %c0_324 = arith.constant 0 : index
    %c0_325 = arith.constant 0 : index
    %c0_326 = arith.constant 0 : index
    %364 = vector.load %arg5[%c0_324, %c0_325, %c0_326] : memref<1x8x384xf32, #tpu.memory_space<vmem>>, vector<1x8x384xf32>
    %365 = vector.shape_cast %364 : vector<1x8x384xf32> to vector<8x384xf32>
    %366 = arith.addf %365, %363 : vector<8x384xf32>
    %c0_327 = arith.constant 0 : index
    %c0_328 = arith.constant 0 : index
    %c0_329 = arith.constant 0 : index
    %367 = vector.load %arg5[%c0_327, %c0_328, %c0_329] : memref<1x8x384xf32, #tpu.memory_space<vmem>>, vector<1x8x384xf32>
    %368 = vector.shape_cast %367 : vector<1x8x384xf32> to vector<8x384xf32>
    %369 = vector.shape_cast %366 : vector<8x384xf32> to vector<1x8x384xf32>
    tpu.vector_store %arg5[%c0_327, %c0_328, %c0_329], %369 {strides = array<i32>} : memref<1x8x384xf32, #tpu.memory_space<vmem>>, vector<1x8x384xf32>,
    return
  }
  func.func @transform_0(%arg0: i32, %arg1: i32) -> (i32, i32, i32) {
    %c0_i32 = arith.constant 0 : i32
    %c0_i32_0 = arith.constant 0 : i32
    %c0_i32_1 = arith.constant 0 : i32
    return %arg0, %c0_i32, %c0_i32_0 : i32, i32, i32
  }
  func.func @transform_1(%arg0: i32, %arg1: i32) -> (i32, i32) {
    %c0_i32 = arith.constant 0 : i32
    %c0_i32_0 = arith.constant 0 : i32
    return %arg1, %c0_i32 : i32, i32
  }
  func.func @transform_2(%arg0: i32, %arg1: i32) -> (i32, i32) {
    %c0_i32 = arith.constant 0 : i32
    %c0_i32_0 = arith.constant 0 : i32
    return %arg1, %c0_i32 : i32, i32
  }
  func.func @transform_3(%arg0: i32, %arg1: i32) -> (i32, i32, i32) {
    %c0_i32 = arith.constant 0 : i32
    %c0_i32_0 = arith.constant 0 : i32
    return %arg0, %arg1, %c0_i32 : i32, i32, i32
  }
}

</mosaic_0001>

<bundles_post_ra>
// kernel: tpu_custom_call.1
= control target key start
LH: loop header
LB: loop body
LE: loop exit
PB: predicated region body
PF: predicated region fallthrough
CT: control target
= control target key end

     0   :  { %8 = vsyncpa [#allocation5], 0  ;;  %s3533_s0 = inlined_call_operand.hbm [shape: f32[2,4,256], index: 0, kind: input, shape index: {}]   ;;  %s3534_s1 = inlined_call_operand.vmem [shape: bf16[8,208], index: 1, kind: input, shape index: {}]   ;;  %s3535_s2 = inlined_call_operand.vmem [shape: f32[8,1], index: 2, kind: input, shape index: {}]   ;;  %s3536_s3 = inlined_call_operand.hbm [shape: f32[2,8,384], index: 3, kind: output, shape index: {}]  }
   0x1   :  { %10 = vsyncpa [#allocation5 + $0x1], 0 }
   0x2   :  { %11 = vsyncpa [#allocation6], 0 }
   0x3   :  { %13 = vsyncpa [#allocation6 + $0x1], 0  ;;  %s3046_s12 = smov 0   ;;  %s3048_s13 = smov 0  }
   0x4   :  { %s3050_s14 = smov 0   ;;  %s3052_s15 = smov 0  }
   0x5   :  { %s3054_s16 = smov 0   ;;  %s3056_s17 = smov 0  }
   0x6 LB: > { %s2492_s18 = sadd.s32 4294967295, %s2983_s17   ;;  %s2493_s19 = sadd.s32 4294967294, %s2983_s17   ;;  %s2983_s17 = sphi %s3056_s17, %s19_s17   ;;  %s2979_s16 = sphi %s3054_s16, %s3552_s16   ;;  %s2975_s15 = sphi %s3052_s15, %s3551_s15   ;;  %s2971_s14 = sphi %s3050_s14, %s3550_s14   ;;  %s2967_s13 = sphi %s3048_s13, %s3549_s13   ;;  %s2963_s12 = sphi %s3046_s12, %s3548_s12  }
   0x7   : > { %s31_s20 = sadd.s32 1, %s2979_s16  ;;  %s38_s21 = sadd.s32 1, %s2971_s14 }
   0x8   : > { %p33_p0 = scmp.ge.s32.totalorder %s31_s20, 2  ;;  %p45_p1 = scmp.ne.s32.totalorder %s2971_s14, %s2967_s13 }
   0x9   : > { %p46_p2 = scmp.eq.s32.totalorder %s2983_s17, 0  ;;  %p51_p3 = scmp.ne.s32.totalorder %s2967_s13, %s2963_s12 }
   0xa   : > { %s3554_s20 = smov (%p33_p0, %s31_s20), 0  ;;  %p52_p5 = scmp.eq.s32.totalorder %s2492_s18, 0 }
   0xb   : > { %p3087_p4 = por %p46_p2, %p45_p1  ;;  %s35_s23 = ssub.s32 %s2979_s16, %s3554_s20 }
   0xc   : > { %p129_p6 = scmp.eq.s32.totalorder %s2492_s18, 1  ;;  %p36_p7 = scmp.eq.s32.totalorder %s35_s23, 0 }
   0xd   : > { %p3093_p8 = por %p52_p5, %p51_p3  ;;  %p135_p10 = scmp.eq.s32.totalorder %s2493_s19, 1 }
   0xe   : > { %p3097_p9 = por %p129_p6, %p45_p1  ;;  %p2767_p13 = scmp.lt.s32.totalorder %s2983_s17, 2 }
   0xf   : > { %s3102_s26 = scalar_select %p36_p7, %s2971_s14, %s38_s21  }
  0x10   : > { %s3540_s25 = scalar_select %p3097_p9, 1, 0 }
  0x11   : > { %p3104_p11 = por %p135_p10, %p51_p3  ;;  %s170_s28 = sand.u32 1, %s2971_s14  }
  0x12   : > { %s2498_s29 = sshll.u32 %s170_s28, 3  ;;  %s2543_s30 = sshll.u32 %s2979_s16, 7 }
  0x13   : > { %s3541_s27 = scalar_select %p3104_p11, 1, 0 }
  0x14   : > { %s3115_s6 = scalar_lea.hbm %s3533_s0, %s2543_s30  ;;  %s174_s7 = scalar_lea.vmem [#allocation4], %s2498_s29 }
  0x15   : > { %s182_s8 = sshll.u32 %s174_s7, 4  ;;  %p3121_p0 = pnand %p2767_p13, %p3087_p4  ;;  %s3117_s8 = int_to_ptr.vmem [resolvable:$true] %s182_s8 }
  0x16   : > { %s171_s10 = scalar_lea.sflag [#allocation5], %s170_s28  ;;  %s2871_s11 = scalar_lea.hbm %s3115_s6, 128 }
  0x17   : > { %p2872_p3 = scmp.ne.s32.totalorder %s3115_s6, %s2871_s11  ;;  %p2873_p5 = pneg %p3121_p0 }
  0x18   : > { %s2876_s21 = scalar_lea.hbm %s3533_s0, 256  ;;  %p2877_p4 = scmp.lt.u32.totalorder %s3115_s6, %s3533_s0 }
  0x19   : > { %p2874_p6 = pnand %p2873_p5, %p2872_p3  ;;  %p2878_p10 = scmp.lt.u32.totalorder %s2876_s21, %s2871_s11 }
  0x1a   : > { %p2880_p12 = scmp.lt.u32.totalorder %s2871_s11, %s3115_s6 }
  0x1b   : > { %p2875_p7 = pneg %p2874_p6  ;;  %p2879_p13 = por %p2878_p10, %p2877_p4 }
  0x1d   : > { %p2881_p1 = por %p2880_p12, %p2879_p13 }
  0x1f   : > { %p2882_p2 = pnand %p2881_p1, %p2875_p7 }
  0x21   : > { %2885 = shalt.err (!%p2882_p2)
}
  0x22   : > { %s2886_s28 = scalar_lea.vmem %s3117_s8, 128  ;;  %s2985_s29 = smov [#allocation4]  }
  0x23   : > { %p2887_p3 = scmp.ne.s32.totalorder %s3117_s8, %s2886_s28  ;;  %s2891_s30 = sshll.u32 %s2985_s29, 4  ;;  %s2892_s30 = int_to_ptr.vmem [resolvable:$false] %s2891_s30 }
  0x24   : > { %s2893_s4 = scalar_lea.vmem %s2892_s30, 256  ;;  %p2894_p9 = scmp.lt.s32.totalorder %s3117_s8, %s2892_s30 }
  0x25   : > { %p2889_p6 = pnand %p2887_p3, %p2873_p5  ;;  %p2895_p4 = scmp.lt.s32.totalorder %s2893_s4, %s2886_s28 }
  0x27   : > { %p2890_p11 = pneg %p2889_p6  ;;  %p2896_p10 = por %p2895_p4, %p2894_p9 }
  0x29   : > { %p2897_p12 = pnand %p2896_p10, %p2890_p11 }
  0x2b   : > { %2900 = shalt.err (!%p2897_p12)
}
  0x2c   : > { %2762 = dma.hbm_to_vmem [thread:$0]  (!%p3121_p0), %s3115_s6, 128, %s3117_s8, %s171_s10  }
  0x2d   : > { %p3543_p1 = scmp.lt.s32.totalorder %s2983_s17, 3  ;;  %p3544_p2 = scmp.ge.s32.totalorder %s2983_s17, 1 }
  0x2f   : > { %p188_p5 = pnand %p3544_p2, %p3543_p1 }
  0x30   : > { %s3157_s5 = sand.u32 (!%p188_p5), 1, %s2967_s13  }
  0x31   : > { %191 = sbr.rel (%p188_p5) target bundleno = 732 (0x2dc), region = 32  ;;  %s2502_s7 = sshll.u32 (!%p188_p5), %s3157_s5, 3 }
  0x32   : > { %s194_s11 = scalar_lea.sflag (!%p188_p5), [#allocation5], %s3157_s5  ;;  %s3161_s18 = scalar_lea.vmem (!%p188_p5), [#allocation4], %s2502_s7 }
  0x38   : > { %2954 = dma.done.wait (%p3093_p8), %s194_s11, 128  }
  0x39   : > { %2956 = vsyncadd (%p3093_p8), %s194_s11, 4294967168  ;;  %v247_v0 = vlaneseq  ;;  %vm239_vm0 = vcmask 607232   ;;  %v2986_v1 = vmov 1983009808   ;;  %v2987_v4 = vmov 0   ;;  %s2988_s24 = smov 75  }
  0x3a   : > { %v245_v2 = vunpack.c.l.s4 %v2986_v1  ;;  %240 = vst.msk [vmem:[#allocation2] sm:$0x3] %vm239_vm0, %v2987_v4  ;;  %527 = vst [vmem:[#allocation3] sm:$0xfc] %v2987_v4  ;;  %649 = vmatprep.mubr.bf16.mxu0 %v2987_v4  ;;  %2856 = vset.pattern.permute.xlu1 %v2987_v4  ;;  %v241_v7 = vld [vmem:[%s3161_s18] sm:$0xf] }
  0x3b   : > { %v248_v3 = vshrl.u32 %v247_v0, 7  ;;  %528 = vst [vmem:[#allocation3 + $0x8] sm:$0xfc] %v2987_v4  ;;  %529 = vst [vmem:[#allocation3 + $0x10] sm:$0xfc] %v2987_v4  ;;  %2857 = vset.pattern.permute.xlu0 %v2987_v4  ;;  %v242_v10 = vpack.c.bf16 %v241_v7, %v241_v7  ;;  %s2989_s6 = smov 83  }
  0x3c   : > { %530 = vst [vmem:[#allocation3 + $0x18] sm:$0xfc] %v2987_v4  ;;  %531 = vst [vmem:[#allocation3 + $0x20] sm:$0xfc] %v2987_v4  ;;  %v246_v5 = vunpack.c.0.s8 %v245_v2  ;;  %v258_v8 = vld [vmem:[%s3161_s18] sm:$0xf] }
  0x3d   : > { %532 = vst [vmem:[#allocation3 + $0x28] sm:$0xfc] %v2987_v4  ;;  %533 = vst [vmem:[#allocation3 + $0x30] sm:$0xfc] %v2987_v4  ;;  %v275_v9 = vld [vmem:[%s3161_s18] sm:$0xf]  ;;  %v259_v11 = vpack.c.bf16 %v258_v8, %v258_v8 }
  0x3e   : > { %534 = vst [vmem:[#allocation3 + $0x38] sm:$0xfc] %v2987_v4  ;;  %535 = vst [vmem:[#allocation3 + $0x40] sm:$0xfc] %v2987_v4  ;;  %v3210_v6 = vsub.s32 %v246_v5, %v248_v3  ;;  %v276_v12 = vpack.c.bf16 %v275_v9, %v275_v9  ;;  %v297_v13 = vld [vmem:[%s3161_s18] sm:$0xf] }
  0x3f   : > { %536 = vst [vmem:[#allocation3 + $0x48] sm:$0xfc] %v2987_v4  ;;  %537 = vst [vmem:[#allocation3 + $0x50] sm:$0xfc] %v2987_v4  ;;  %v314_v14 = vld [vmem:[%s3161_s18] sm:$0xf]  ;;  %v298_v15 = vpack.c.bf16 %v297_v13, %v297_v13 }
  0x40   : > { %538 = vst [vmem:[#allocation3 + $0x58] sm:$0xfc] %v2987_v4  ;;  %539 = vst [vmem:[#allocation3 + $0x60] sm:$0xfc] %v2987_v4  ;;  %v331_v16 = vld [vmem:[%s3161_s18] sm:$0xf]  ;;  %v250_v17 = vrot.slane %v242_v10, %v3210_v6  ;;  %v267_v18 = vrot.slane %v259_v11, %v3210_v6  ;;  %v315_v19 = vpack.c.bf16 %v314_v14, %v314_v14 }
  0x41   : > { %540 = vst [vmem:[#allocation3 + $0x68] sm:$0xfc] %v2987_v4  ;;  %541 = vst [vmem:[#allocation3 + $0x70] sm:$0xfc] %v2987_v4  ;;  %v284_v20 = vrot.slane %v276_v12, %v3210_v6  ;;  %v306_v21 = vrot.slane %v298_v15, %v3210_v6  ;;  %v332_v22 = vpack.c.bf16 %v331_v16, %v331_v16  ;;  %v365_v23 = vld [vmem:[%s3161_s18] sm:$0xf] }
  0x42   : > { %542 = vst [vmem:[#allocation3 + $0x78] sm:$0xfc] %v2987_v4  ;;  %543 = vst [vmem:[#allocation3 + $0x80] sm:$0xfc] %v2987_v4  ;;  %251 = vrot.lane.b32.xlu0 %v250_v17, %s2988_s24  ;;  %268 = vrot.lane.b32.xlu1 %v267_v18, %s2989_s6  ;;  %v348_v24 = vld [vmem:[%s3161_s18] sm:$0xf]  ;;  %v366_v25 = vpack.c.bf16 %v365_v23, %v365_v23  ;;  %v323_v26 = vrot.slane %v315_v19, %v3210_v6 }
  0x43   : > { %544 = vst [vmem:[#allocation3 + $0x88] sm:$0xfc] %v2987_v4  ;;  %545 = vst [vmem:[#allocation3 + $0x90] sm:$0xfc] %v2987_v4  ;;  %s2990_s8 = smov 91   ;;  %s2991_s9 = smov 99   ;;  %v340_v27 = vrot.slane %v332_v22, %v3210_v6  ;;  %v349_v28 = vpack.c.bf16 %v348_v24, %v348_v24 }
  0x44   : > { %546 = vst [vmem:[#allocation3 + $0x98] sm:$0xfc] %v2987_v4  ;;  %547 = vst [vmem:[#allocation3 + $0xa0] sm:$0xfc] %v2987_v4  ;;  %v387_v29 = vld [vmem:[%s3161_s18 + $0x4] sm:$0xf]  ;;  %v374_v31 = vrot.slane %v366_v25, %v3210_v6 }
  0x45   : > { %548 = vst [vmem:[#allocation3 + $0xa8] sm:$0xfc] %v2987_v4  ;;  %549 = vst [vmem:[#allocation3 + $0xb0] sm:$0xfc] %v2987_v4  ;;  %v404_v30 = vld [vmem:[%s3161_s18 + $0x4] sm:$0xf]  ;;  %v357_v32 = vrot.slane %v349_v28, %v3210_v6  ;;  %v388_v33 = vpack.c.bf16 %v387_v29, %v387_v29 }
  0x46   : > { %550 = vst [vmem:[#allocation3 + $0xb8] sm:$0xfc] %v2987_v4  ;;  %551 = vst [vmem:[#allocation3 + $0xc0] sm:$0xfc] %v2987_v4  ;;  %285 = vrot.lane.b32.xlu0 %v284_v20, %s2990_s8  ;;  %307 = vrot.lane.b32.xlu1 %v306_v21, %s2991_s9  ;;  %s2992_s10 = smov 107   ;;  %s2993_s19 = smov 115   ;;  %v405_v34 = vpack.c.bf16 %v404_v30, %v404_v30 }
  0x47   : > { %552 = vst [vmem:[#allocation3 + $0xc8] sm:$0xfc] %v2987_v4  ;;  %553 = vst [vmem:[#allocation3 + $0xd0] sm:$0xfc] %v2987_v4  ;;  %v421_v35 = vld [vmem:[%s3161_s18 + $0x4] sm:$0xf]  ;;  %v396_v38 = vrot.slane %v388_v33, %v3210_v6 }
  0x48   : > { %554 = vst [vmem:[#allocation3 + $0xd8] sm:$0xfc] %v2987_v4  ;;  %555 = vst [vmem:[#allocation3 + $0xe0] sm:$0xfc] %v2987_v4  ;;  %v438_v36 = vld [vmem:[%s3161_s18 + $0x4] sm:$0xf]  ;;  %v422_v37 = vpack.c.bf16 %v421_v35, %v421_v35  ;;  %v413_v39 = vrot.slane %v405_v34, %v3210_v6 }
  0x49   : > { %556 = vst [vmem:[#allocation3 + $0xe8] sm:$0xfc] %v2987_v4  ;;  %557 = vst [vmem:[#allocation3 + $0xf0] sm:$0xfc] %v2987_v4  ;;  %s2994_s21 = smov 3   ;;  %s2995_s22 = smov 123   ;;  %v439_v40 = vpack.c.bf16 %v438_v36, %v438_v36 }
  0x4a   : > { %558 = vst [vmem:[#allocation3 + $0xf8] sm:$0xfc] %v2987_v4  ;;  %559 = vst [vmem:[#allocation3 + $0x100] sm:$0xfc] %v2987_v4  ;;  %324 = vrot.lane.b32.xlu0 %v323_v26, %s2992_s10  ;;  %341 = vrot.lane.b32.xlu1 %v340_v27, %s2993_s19  ;;  %v455_v41 = vld [vmem:[%s3161_s18 + $0x4] sm:$0xf]  ;;  %v430_v44 = vrot.slane %v422_v37, %v3210_v6 }
  0x4b   : > { %560 = vst [vmem:[#allocation3 + $0x108] sm:$0xfc] %v2987_v4  ;;  %561 = vst [vmem:[#allocation3 + $0x110] sm:$0xfc] %v2987_v4  ;;  %v472_v42 = vld [vmem:[%s3161_s18 + $0x4] sm:$0xf]  ;;  %v456_v43 = vpack.c.bf16 %v455_v41, %v455_v41  ;;  %v447_v45 = vrot.slane %v439_v40, %v3210_v6 }
  0x4c   : > { %562 = vst [vmem:[#allocation3 + $0x118] sm:$0xfc] %v2987_v4  ;;  %563 = vst [vmem:[#allocation3 + $0x120] sm:$0xfc] %v2987_v4  ;;  %s2996_s23 = smov 11   ;;  %s2997_s28 = smov 19   ;;  %v473_v46 = vpack.c.bf16 %v472_v42, %v472_v42 }
  0x4d   : > { %564 = vst [vmem:[#allocation3 + $0x128] sm:$0xfc] %v2987_v4  ;;  %565 = vst [vmem:[#allocation3 + $0x130] sm:$0xfc] %v2987_v4  ;;  %v489_v47 = vld [vmem:[%s3161_s18 + $0x4] sm:$0xf]  ;;  %v464_v50 = vrot.slane %v456_v43, %v3210_v6 }
  0x4e   : > { %375 = vrot.lane.b32.xlu0 %v374_v31, %s2994_s21  ;;  %358 = vrot.lane.b32.xlu1 %v357_v32, %s2995_s22  ;;  %v506_v48 = vld [vmem:[%s3161_s18 + $0x4] sm:$0xf]  ;;  %v490_v49 = vpack.c.bf16 %v489_v47, %v489_v47  ;;  %s2998_s29 = smov 27   ;;  %s2999_s30 = smov 35   ;;  %v481_v51 = vrot.slane %v473_v46, %v3210_v6  ;;  %vm254_vm1 = vcmask 738904   ;;  %vm256_vm2 = vcmask 804568  }
  0x4f   : > { %v507_v52 = vpack.c.bf16 %v506_v48, %v506_v48  ;;  %s3000_s4 = smov 43   ;;  %s3001_s7 = smov 51   ;;  %vm271_vm3 = vcmask 935704   ;;  %vm273_vm4 = vcmask 1001368   ;;  %vm291_vm5 = vcmask 1042392  }
  0x50   : > { %v498_v53 = vrot.slane %v490_v49, %v3210_v6  ;;  %s3002_s11 = smov 59   ;;  %s3003_s18 = smov 67   ;;  %vm292_vm6 = vcmask 84994   ;;  %vm288_vm7 = vcmask 744448   ;;  %vm295_vm9 = vcmask 148568  }
  0x51   : > { %v515_v54 = vrot.slane %v507_v52, %v3210_v6  ;;  %vm293_vm8 = vmor %vm292_vm6, %vm291_vm5  ;;  %vm310_vm10 = vcmask 279704   ;;  %vm312_vm11 = vcmask 345368   ;;  %vm327_vm12 = vcmask 476504   ;;  %s3004_s24 = smov 56   ;;  %s3007_s6 = smov 55  }
  0x52   : > { %397 = vrot.lane.b32.xlu0 %v396_v38, %s2996_s23  ;;  %414 = vrot.lane.b32.xlu1 %v413_v39, %s2997_s28  ;;  %vm329_vm13 = vcmask 542168   ;;  %vm344_vm14 = vcmask 673304   ;;  %vm346_vm15 = vcmask 738968   ;;  %vm381_vm0 = vcmask 1042328   ;;  %s3008_s8 = smov 54   ;;  %s3009_s19 = smov 112  }
  0x53   : > { %v3005_v18 = vmov 0.0   ;;  %v2859_v20 = vld [vmem:[%s3534_s1] ss:$0 sps:$4 sm:$0xff]   ;;  %s3010_s21 = smov 53   ;;  %s3011_s28 = smov 96  }
  0x54   : > { %2570 = vmatprep.subr.bf16.mxu1 %v3005_v18  ;;  %v2860_v21 = vld [vmem:[%s3534_s1] ss:$0 sps:$4 sm:$0xff]   ;;  %s3017_s22 = smov 125   ;;  %s3022_s9 = smov 29   ;;  %v2866_v27 = vld [vmem:[%s3534_s1 + $0x4] ss:$0 sps:$4 sm:$0xff]  }
  0x55   : > { %v2861_v22 = vld [vmem:[%s3534_s1] ss:$0 sps:$4 sm:$0xff]   ;;  %v2867_v29 = vld [vmem:[%s3534_s1 + $0x4] ss:$0 sps:$4 sm:$0xff]   ;;  %s2753_s10 = smul.u32 24, %s3157_s5  ;;  %p3545_p9 = scmp.ne.s32.totalorder %s3540_s25, 0 }
  0x56   : > { %431 = vrot.lane.b32.xlu0 %v430_v44, %s2998_s29  ;;  %448 = vrot.lane.b32.xlu1 %v447_v45, %s2999_s30  ;;  %s3012_s29 = smov 52   ;;  %v2862_v23 = vld [vmem:[%s3534_s1] ss:$0 sps:$4 sm:$0xff]   ;;  %s3019_s30 = smov 101   ;;  %v2869_v33 = vld [vmem:[%s3534_s1 + $0x4] ss:$0 sps:$4 sm:$0xff]  }
  0x57   : > { %v2863_v24 = vld [vmem:[%s3534_s1] ss:$0 sps:$4 sm:$0xff]   ;;  %v2870_v43 = vld [vmem:[%s3534_s1 + $0x4] ss:$0 sps:$4 sm:$0xff]  }
  0x58   : > { %v2864_v25 = vld [vmem:[%s3534_s1] ss:$0 sps:$4 sm:$0xff]  }
  0x59   : > { %v2865_v26 = vld [vmem:[%s3534_s1] ss:$0 sps:$4 sm:$0xff]  }
  0x5a   : > { %465 = vrot.lane.b32.xlu0 %v464_v50, %s3000_s4  ;;  %482 = vrot.lane.b32.xlu1 %v481_v51, %s3001_s7 }
  0x5e   : > { %499 = vrot.lane.b32.xlu0 %v498_v53, %s3002_s11  ;;  %516 = vrot.lane.b32.xlu1 %v515_v54, %s3003_s18  ;;  %s3013_s11 = smov 80   ;;  %v603_v53 = vld [vmem:[%s3534_s1] sm:$0xf] }
  0xb4   : > { %v252_v55 = vpop.permute.xlu0 %251  ;;  %v269_v56 = vpop.permute.xlu1 %268 }
  0xb5   : > { %255 = vst.msk [vmem:[#allocation2] sm:$0x3] %vm254_vm1, %v252_v55  ;;  %vm382_vm1 = vcmask 19458  }
  0xb6   : > { %257 = vst.msk [vmem:[#allocation2] sm:$0x3] %vm256_vm2, %v2987_v4  ;;  %vm361_vm2 = vcmask 870104   ;;  %vm383_vm6 = vmor %vm382_vm1, %vm381_vm0  ;;  %vm468_vm0 = vcmask 1001304  }
  0xb7   : > { %272 = vst.msk [vmem:[#allocation2] sm:$0x3] %vm271_vm3, %v269_v56  ;;  %vm378_vm3 = vcmask 23552  }
  0xb8   : > { %274 = vst.msk [vmem:[#allocation2] sm:$0x3] %vm273_vm4, %v2987_v4  ;;  %v286_v57 = vpop.permute.xlu0 %285  ;;  %v308_v58 = vpop.permute.xlu1 %307  ;;  %vm363_vm4 = vcmask 935768  }
  0xb9   : > { %v287_v59 = vrot.slane %v286_v57, 6 }
  0xbb   : > { %v289_v60 = vsel %vm288_vm7, %v287_v59, %v286_v57  ;;  %vm385_vm7 = vcmask 82968  }
  0xbc   : > { %294 = vst.msk [vmem:[#allocation2] sm:$0xf] %vm293_vm8, %v289_v60  ;;  %v325_v61 = vpop.permute.xlu0 %324  ;;  %v342_v62 = vpop.permute.xlu1 %341  ;;  %vm400_vm8 = vcmask 214104  }
  0xbd   : > { %296 = vst.msk [vmem:[#allocation2 + $0x2] sm:$0x3] %vm295_vm9, %v2987_v4  ;;  %vm402_vm9 = vcmask 279768  }
  0xbe   : > { %311 = vst.msk [vmem:[#allocation2 + $0x2] sm:$0x3] %vm310_vm10, %v308_v58  ;;  %vm417_vm10 = vcmask 410904  }
  0xbf   : > { %313 = vst.msk [vmem:[#allocation2 + $0x2] sm:$0x3] %vm312_vm11, %v2987_v4  ;;  %vm419_vm11 = vcmask 476568  }
  0xc0   : > { %328 = vst.msk [vmem:[#allocation2 + $0x2] sm:$0x3] %vm327_vm12, %v325_v61  ;;  %v376_v63 = vpop.permute.xlu0 %375  ;;  %v359_v0 = vpop.permute.xlu1 %358  ;;  %vm434_vm12 = vcmask 607704  }
  0xc1   : > { %330 = vst.msk [vmem:[#allocation2 + $0x2] sm:$0x3] %vm329_vm13, %v2987_v4  ;;  %v377_v1 = vrot.slane %v376_v63, 6  ;;  %vm436_vm13 = vcmask 673368  }
  0xc2   : > { %345 = vst.msk [vmem:[#allocation2 + $0x2] sm:$0x3] %vm344_vm14, %v342_v62  ;;  %vm451_vm14 = vcmask 804504  }
  0xc3   : > { %347 = vst.msk [vmem:[#allocation2 + $0x2] sm:$0x3] %vm346_vm15, %v2987_v4  ;;  %v379_v5 = vsel %vm378_vm3, %v377_v1, %v376_v63  ;;  %vm453_vm15 = vcmask 870168   ;;  %vm485_vm3 = vcmask 148504  }
  0xc4   : > { %362 = vst.msk [vmem:[#allocation2 + $0x2] sm:$0x3] %vm361_vm2, %v359_v0  ;;  %v398_v2 = vpop.permute.xlu0 %397  ;;  %v415_v3 = vpop.permute.xlu1 %414  ;;  %vm470_vm2 = vmor %vm382_vm1, %vm291_vm5  ;;  %vm3006_vm1 = vmmov 0  }
  0xc5   : > { %364 = vst.msk [vmem:[#allocation2 + $0x2] sm:$0x3] %vm363_vm4, %v2987_v4  ;;  %vm487_vm4 = vcmask 214168   ;;  %2572 = vmatprep.mubr.msk.bf16.mxu1 %vm3006_vm1, %v3005_v18 }
  0xc6   : > { %384 = vst.msk [vmem:[#allocation2 + $0x2] sm:$0xf] %vm383_vm6, %v379_v5  ;;  %vm502_vm6 = vcmask 345304  }
  0xc7   : > { %386 = vst.msk [vmem:[#allocation2 + $0x4] sm:$0x3] %vm385_vm7, %v2987_v4  ;;  %vm504_vm7 = vcmask 410968  }
  0xc8   : > { %401 = vst.msk [vmem:[#allocation2 + $0x4] sm:$0x3] %vm400_vm8, %v398_v2  ;;  %v432_v7 = vpop.permute.xlu0 %431  ;;  %v449_v8 = vpop.permute.xlu1 %448  ;;  %vm523_vm8 = vcmask 1042008  }
  0xc9   : > { %403 = vst.msk [vmem:[#allocation2 + $0x4] sm:$0x3] %vm402_vm9, %v2987_v4  ;;  %vm524_vm9 = vcmask 322562  }
  0xca   : > { %418 = vst.msk [vmem:[#allocation2 + $0x4] sm:$0x3] %vm417_vm10, %v415_v3  ;;  %vm519_vm10 = vcmask 542104   ;;  %vm525_vm5 = vmor %vm524_vm9, %vm523_vm8  ;;  %vm1835_vm8 = vcmask 629760   ;;  %vm1974_vm9 = vcmask 236544  }
  0xcb   : > { %420 = vst.msk [vmem:[#allocation2 + $0x4] sm:$0x3] %vm419_vm11, %v2987_v4  ;;  %vm521_vm11 = vcmask 607768  }
  0xcc   : > { %435 = vst.msk [vmem:[#allocation2 + $0x4] sm:$0x3] %vm434_vm12, %v432_v7  ;;  %v466_v9 = vpop.permute.xlu0 %465  ;;  %v483_v10 = vpop.permute.xlu1 %482  ;;  %vm593_vm12 = vcmask 457728  }
  0xcd   : > { %437 = vst.msk [vmem:[#allocation2 + $0x4] sm:$0x3] %vm436_vm13, %v2987_v4  ;;  %vm728_vm13 = vcmask 449536  }
  0xce   : > { %452 = vst.msk [vmem:[#allocation2 + $0x4] sm:$0x3] %vm451_vm14, %v449_v8  ;;  %vm867_vm14 = vcmask 441344  }
  0xcf   : > { %454 = vst.msk [vmem:[#allocation2 + $0x4] sm:$0x3] %vm453_vm15, %v2987_v4  ;;  %vm613_vm15 = vcmask 130048  }
  0xd0   : > { %469 = vst.msk [vmem:[#allocation2 + $0x4] sm:$0x3] %vm468_vm0, %v466_v9  ;;  %v500_v11 = vpop.permute.xlu0 %499  ;;  %v517_v12 = vpop.permute.xlu1 %516  ;;  %vm1006_vm0 = vcmask 433152  }
  0xd1   : > { %471 = vst.msk [vmem:[#allocation2 + $0x4] sm:$0xf] %vm470_vm2, %v2987_v4  ;;  %vm1145_vm2 = vcmask 424960  }
  0xd2   : > { %486 = vst.msk [vmem:[#allocation2 + $0x6] sm:$0x3] %vm485_vm3, %v483_v10  ;;  %vm1284_vm3 = vcmask 416768  }
  0xd3   : > { %488 = vst.msk [vmem:[#allocation2 + $0x6] sm:$0x3] %vm487_vm4, %v2987_v4  ;;  %vm1423_vm4 = vcmask 408576  }
  0xd4   : > { %503 = vst.msk [vmem:[#allocation2 + $0x6] sm:$0x3] %vm502_vm6, %v500_v11  ;;  %vm1562_vm6 = vcmask 1022976  }
  0xd5   : > { %505 = vst.msk [vmem:[#allocation2 + $0x6] sm:$0x3] %vm504_vm7, %v2987_v4  ;;  %vm1701_vm7 = vcmask 826368  }
  0xd6   : > { %520 = vst.msk [vmem:[#allocation2 + $0x6] sm:$0x3] %vm519_vm10, %v517_v12  ;;  %vm2113_vm10 = vcmask 39936  }
  0xd7   : > { %522 = vst.msk [vmem:[#allocation2 + $0x6] sm:$0x3] %vm521_vm11, %v2987_v4  ;;  %vm2252_vm11 = vcmask 891904  }
  0xd8   : > { %526 = vst.msk [vmem:[#allocation2 + $0x6] sm:$0xf] %vm525_vm5, %v2987_v4 }
  0xdf   : > { %v566_v13 = vld [vmem:[#allocation2] sm:$0xff] }
  0xe0   : > { %v3267_v14 = vrot.slane %v566_v13, %v3210_v6  ;;  %v568_v15 = vcombine.high %v566_v13, %v566_v13  ;;  %v2225_v28 = vld [vmem:[#allocation2 + $0x2] sm:$0xff] }
  0xe1   : > { %v2234_v30 = vrot.slane %v2225_v28, %v3210_v6  ;;  %v2227_v32 = vcombine.high %v2225_v28, %v2225_v28 }
  0xe2   : > { %v3271_v16 = vcombine.high %v3267_v14, %v3267_v14  ;;  %v3274_v17 = vrot.slane %v568_v15, %v3210_v6 }
  0xe3   : > { %v2242_v31 = vcombine.high %v2234_v30, %v2234_v30  ;;  %v2241_v36 = vrot.slane %v2227_v32, %v3210_v6 }
  0xe4   : > { %587 = vrot.lane.b32.xlu0 %v3271_v16, %s3004_s24  ;;  %589 = vrot.lane.b32.xlu1 %v3274_v17, %s3004_s24  ;;  %v3283_v19 = vcombine.high %v3274_v17, %v3274_v17 }
  0xe5   : > { %v2243_v40 = vcombine.high %v2241_v36, %v2241_v36 }
  0xe8   : > { %585 = vrot.lane.b32.xlu0 %v3267_v14, %s3004_s24  ;;  %591 = vrot.lane.b32.xlu1 %v3283_v19, %s3004_s24  ;;  %s3020_s24 = smov 16  }
  0xec   : > { %722 = vrot.lane.b32.xlu0 %v3271_v16, %s3007_s6  ;;  %724 = vrot.lane.b32.xlu1 %v3274_v17, %s3007_s6 }
  0xf0   : > { %720 = vrot.lane.b32.xlu0 %v3267_v14, %s3007_s6  ;;  %726 = vrot.lane.b32.xlu1 %v3283_v19, %s3007_s6  ;;  %s3014_s6 = smov 64  }
  0xf4   : > { %861 = vrot.lane.b32.xlu0 %v3271_v16, %s3008_s8  ;;  %863 = vrot.lane.b32.xlu1 %v3274_v17, %s3008_s8 }
  0xf8   : > { %745 = vrot.lane.b32.xlu0 %v2859_v20, %s3009_s19  ;;  %859 = vrot.lane.b32.xlu1 %v3267_v14, %s3008_s8 }
  0xfc   : > { %865 = vrot.lane.b32.xlu0 %v3283_v19, %s3008_s8  ;;  %1000 = vrot.lane.b32.xlu1 %v3271_v16, %s3010_s21  ;;  %s3015_s8 = smov 50  }
 0x100   : > { %1002 = vrot.lane.b32.xlu0 %v3274_v17, %s3010_s21  ;;  %884 = vrot.lane.b32.xlu1 %v2860_v21, %s3011_s28 }
 0x104   : > { %998 = vrot.lane.b32.xlu0 %v3267_v14, %s3010_s21  ;;  %1004 = vrot.lane.b32.xlu1 %v3283_v19, %s3010_s21  ;;  %s3016_s21 = smov 48  }
 0x108   : > { %1139 = vrot.lane.b32.xlu0 %v3271_v16, %s3012_s29  ;;  %1141 = vrot.lane.b32.xlu1 %v3274_v17, %s3012_s29 }
 0x10c   : > { %1023 = vrot.lane.b32.xlu0 %v2861_v22, %s3013_s11  ;;  %1137 = vrot.lane.b32.xlu1 %v3267_v14, %s3012_s29 }
 0x110   : > { %1143 = vrot.lane.b32.xlu0 %v3283_v19, %s3012_s29  ;;  %1278 = vrot.lane.b32.xlu1 %v3271_v16, %s3001_s7  ;;  %s3018_s29 = smov 32  }
 0x114   : > { %1280 = vrot.lane.b32.xlu0 %v3274_v17, %s3001_s7  ;;  %1162 = vrot.lane.b32.xlu1 %v2862_v23, %s3014_s6 }
 0x118   : > { %1276 = vrot.lane.b32.xlu0 %v3267_v14, %s3001_s7  ;;  %1282 = vrot.lane.b32.xlu1 %v3283_v19, %s3001_s7 }
 0x11c   : > { %1417 = vrot.lane.b32.xlu0 %v3271_v16, %s3015_s8  ;;  %1419 = vrot.lane.b32.xlu1 %v3274_v17, %s3015_s8 }
 0x120   : > { %1301 = vrot.lane.b32.xlu0 %v2863_v24, %s3016_s21  ;;  %1415 = vrot.lane.b32.xlu1 %v3267_v14, %s3015_s8  ;;  %s2754_s21 = smul.u32 384, %s2975_s15  ;;  %s2365_s15 = scalar_lea.sflag [#allocation6], %s3157_s5 }
 0x124   : > { %1421 = vrot.lane.b32.xlu0 %v3283_v19, %s3015_s8  ;;  %1556 = vrot.lane.b32.xlu1 %v3271_v16, %s3017_s22  ;;  %s3021_s8 = smov 77  }
 0x128   : > { %1558 = vrot.lane.b32.xlu0 %v3274_v17, %s3017_s22  ;;  %1440 = vrot.lane.b32.xlu1 %v2864_v25, %s3018_s29  ;;  %s3484_s29 = scalar_lea.hbm %s3536_s3, %s2754_s21 }
 0x12c   : > { %1554 = vrot.lane.b32.xlu0 %v3267_v14, %s3017_s22  ;;  %1560 = vrot.lane.b32.xlu1 %v3283_v19, %s3017_s22  ;;  %s3023_s22 = smov 5  }
 0x130   : > { %1695 = vrot.lane.b32.xlu0 %v3271_v16, %s3019_s30  ;;  %1697 = vrot.lane.b32.xlu1 %v3274_v17, %s3019_s30 }
 0x134   : > { %1579 = vrot.lane.b32.xlu0 %v2865_v26, %s3020_s24  ;;  %1693 = vrot.lane.b32.xlu1 %v3267_v14, %s3019_s30 }
 0x138   : > { %1699 = vrot.lane.b32.xlu0 %v3283_v19, %s3019_s30  ;;  %1829 = vrot.lane.b32.xlu1 %v3271_v16, %s3021_s8 }
 0x13c   : > { %1831 = vrot.lane.b32.xlu0 %v3274_v17, %s3021_s8  ;;  %1827 = vrot.lane.b32.xlu1 %v3267_v14, %s3021_s8 }
 0x140   : > { %1833 = vrot.lane.b32.xlu0 %v3283_v19, %s3021_s8  ;;  %1968 = vrot.lane.b32.xlu1 %v3271_v16, %s3022_s9 }
 0x144   : > { %1970 = vrot.lane.b32.xlu0 %v3274_v17, %s3022_s9  ;;  %1852 = vrot.lane.b32.xlu1 %v2866_v27, %s3009_s19  ;;  %s3024_s19 = smov 109  }
 0x148   : > { %1966 = vrot.lane.b32.xlu0 %v3267_v14, %s3022_s9  ;;  %1972 = vrot.lane.b32.xlu1 %v3283_v19, %s3022_s9 }
 0x14c   : > { %2107 = vrot.lane.b32.xlu0 %v3271_v16, %s3023_s22  ;;  %2109 = vrot.lane.b32.xlu1 %v3274_v17, %s3023_s22 }
 0x150   : > { %1991 = vrot.lane.b32.xlu0 %v2867_v29, %s3011_s28  ;;  %2105 = vrot.lane.b32.xlu1 %v3267_v14, %s3023_s22  ;;  %v607_v14 = vld [vmem:[%s3535_s2] sm:$0xff]  ;;  %s3025_s28 = smov [#allocation7]  }
 0x151   : > { %s2905_s4 = sshll.u32 %s3025_s28, 4  ;;  %s2906_s4 = int_to_ptr.vmem [resolvable:$false] %s2905_s4 }
 0x154   : > { %2111 = vrot.lane.b32.xlu0 %v3283_v19, %s3023_s22  ;;  %2246 = vrot.lane.b32.xlu1 %v2242_v31, %s3024_s19  ;;  %s228_s22 = scalar_lea.vmem [#allocation7], %s2753_s10 }
 0x155   : > { %s2381_s23 = sshll.u32 %s228_s22, 4  ;;  %s3486_s23 = int_to_ptr.vmem [resolvable:$true] %s2381_s23 }
 0x156   : > { %v588_v34 = vpop.permute.xlu0 %587  ;;  %v590_v35 = vpop.permute.xlu1 %589  ;;  %s2901_s30 = scalar_lea.vmem %s3486_s23, 384  ;;  %p2908_p7 = scmp.lt.s32.totalorder %s3486_s23, %s2906_s4 }
 0x157   : > { %v595_v37 = vsel %vm593_vm12, %v588_v34, %v590_v35  ;;  %p2902_p8 = scmp.ne.s32.totalorder %s3486_s23, %s2901_s30 }
 0x158   : > { %601 = vst [vmem:[#allocation3 + $0x8] sm:$0x3] %v595_v37  ;;  %2248 = vrot.lane.b32.xlu0 %v2241_v36, %s3024_s19  ;;  %2130 = vrot.lane.b32.xlu1 %v2869_v33, %s3013_s11  ;;  %s2907_s11 = scalar_lea.vmem %s2906_s4, 768 }
 0x159   : > { %p2903_p11 = pnand %p2902_p8, %p3545_p9  ;;  %p2909_p13 = scmp.lt.s32.totalorder %s2907_s11, %s2901_s30 }
 0x15a   : > { %v586_v38 = vpop.permute.xlu0 %585  ;;  %v592_v39 = vpop.permute.xlu1 %591 }
 0x15b   : > { %v594_v41 = vsel %vm593_vm12, %v586_v38, %v588_v34  ;;  %v596_v42 = vsel %vm593_vm12, %v590_v35, %v592_v39  ;;  %p2904_p0 = pneg %p2903_p11  ;;  %p2910_p3 = por %p2909_p13, %p2908_p7 }
 0x15c   : > { %600 = vst [vmem:[#allocation3] sm:$0x3] %v594_v41  ;;  %602 = vst [vmem:[#allocation3 + $0x10] sm:$0x3] %v596_v42  ;;  %2244 = vrot.lane.b32.xlu0 %v2234_v30, %s3024_s19  ;;  %2250 = vrot.lane.b32.xlu1 %v2243_v40, %s3024_s19 }
 0x15d   : > { %p2911_p6 = pnand %p2910_p3, %p2904_p0 }
 0x15e   : > { %v723_v6 = vpop.permute.xlu0 %722  ;;  %v725_v44 = vpop.permute.xlu1 %724 }
 0x15f   : > { %v730_v45 = vsel %vm728_vm13, %v723_v6, %v725_v44  ;;  %v605_v46 = vld [vmem:[#allocation3 + $0x8] sm:$0xff] }
 0x160   : > { %736 = vst [vmem:[#allocation3 + $0x20] sm:$0x3] %v730_v45  ;;  %617 = vmatprep.subr.bf16.mxu0 %v605_v46  ;;  %2269 = vrot.lane.b32.xlu0 %v2870_v43, %s3014_s6 }
 0x161   : > { %610 = vperm.xlu1 %2856, %v607_v14  }
 0x162   : > { %v721_v47 = vpop.permute.xlu0 %720  ;;  %v727_v48 = vpop.permute.xlu1 %726 }
 0x163   : > { %v729_v49 = vsel %vm728_vm13, %v721_v47, %v723_v6  ;;  %v731_v50 = vsel %vm728_vm13, %v725_v44, %v727_v48  ;;  %v604_v51 = vld [vmem:[#allocation3] sm:$0xff]  ;;  %v606_v52 = vld [vmem:[#allocation3 + $0x10] sm:$0xff] }
 0x164   : > { %735 = vst [vmem:[#allocation3 + $0x18] sm:$0x3] %v729_v49  ;;  %737 = vst [vmem:[#allocation3 + $0x28] sm:$0x3] %v731_v50  ;;  %618 = vmatpush1.bf16.msra.mxu0 %v604_v51  ;;  %2571 = vmatpush3.bf16.msra.mxu1 %v606_v52 }
 0x165   : > { %2576 = vmatprep.subr.bf16.mxu1 %v3005_v18 }
 0x166   : > { %v862_v54 = vpop.permute.xlu0 %861  ;;  %v864_v55 = vpop.permute.xlu1 %863 }
 0x167   : > { %v869_v56 = vsel %vm867_vm14, %v862_v54, %v864_v55  ;;  %2503 = vmatmul.mubr.msk.bf16.vlgmr.msra.gmra.mrb[0].mxu0 %vm613_vm15, %v603_v53  ;;  %2573 = vmatmul.mubr.msk.bf16.vlgmr.msra.gmra.mrb[0].mxu1 %vm613_vm15, %v603_v53  ;;  %v740_v57 = vld [vmem:[#allocation3 + $0x20] sm:$0xff] }
 0x168   : > { %875 = vst [vmem:[#allocation3 + $0x38] sm:$0x3] %v869_v56  ;;  %750 = vmatprep.subr.bf16.mxu0 %v740_v57  ;;  %782 = vmatprep.mubr.bf16.mxu0 %v2987_v4 }
 0x169   : > { %2578 = vmatprep.mubr.msk.bf16.mxu1 %vm3006_vm1, %v3005_v18 }
 0x16a   : > { %v746_v58 = vpop.permute.xlu0 %745  ;;  %v860_v59 = vpop.permute.xlu1 %859 }
 0x16b   : > { %v868_v60 = vsel %vm867_vm14, %v860_v59, %v862_v54  ;;  %v739_v61 = vld [vmem:[#allocation3 + $0x18] sm:$0xff]  ;;  %v741_v62 = vld [vmem:[#allocation3 + $0x28] sm:$0xff] }
 0x16c   : > { %874 = vst [vmem:[#allocation3 + $0x30] sm:$0x3] %v868_v60  ;;  %751 = vmatpush1.bf16.msra.mxu0 %v739_v61  ;;  %2577 = vmatpush3.bf16.msra.mxu1 %v741_v62 }
 0x16d   : > { %2582 = vmatprep.subr.bf16.mxu1 %v3005_v18 }
 0x16e   : > { %v866_v63 = vpop.permute.xlu0 %865  ;;  %v1001_v0 = vpop.permute.xlu1 %1000 }
 0x16f   : > { %v870_v1 = vsel %vm867_vm14, %v864_v55, %v866_v63  ;;  %v879_v2 = vld [vmem:[#allocation3 + $0x38] sm:$0xff] }
 0x170   : > { %876 = vst [vmem:[#allocation3 + $0x40] sm:$0x3] %v870_v1  ;;  %889 = vmatprep.subr.bf16.mxu0 %v879_v2 }
 0x172   : > { %v1003_v3 = vpop.permute.xlu0 %1002  ;;  %v885_v5 = vpop.permute.xlu1 %884 }
 0x173   : > { %v1008_v7 = vsel %vm1006_vm0, %v1001_v0, %v1003_v3  ;;  %2506 = vmatmul.mubr.msk.bf16.vlgmr.msra.gmra.mrb[0].mxu0 %vm613_vm15, %v746_v58  ;;  %2579 = vmatmul.mubr.msk.bf16.vlgmr.msra.gmra.mrb[0].mxu1 %vm613_vm15, %v746_v58  ;;  %v878_v8 = vld [vmem:[#allocation3 + $0x30] sm:$0xff] }
 0x174   : > { %1014 = vst [vmem:[#allocation3 + $0x50] sm:$0x3] %v1008_v7  ;;  %890 = vmatpush1.bf16.msra.mxu0 %v878_v8  ;;  %921 = vmatprep.mubr.bf16.mxu0 %v2987_v4 }
 0x175   : > { %2584 = vmatprep.mubr.msk.bf16.mxu1 %vm3006_vm1, %v3005_v18 }
 0x176   : > { %v999_v9 = vpop.permute.xlu0 %998  ;;  %v1005_v10 = vpop.permute.xlu1 %1004 }
 0x177   : > { %v1007_v11 = vsel %vm1006_vm0, %v999_v9, %v1001_v0  ;;  %v1009_v12 = vsel %vm1006_vm0, %v1003_v3, %v1005_v10  ;;  %v880_v13 = vld [vmem:[#allocation3 + $0x40] sm:$0xff] }
 0x178   : > { %1013 = vst [vmem:[#allocation3 + $0x48] sm:$0x3] %v1007_v11  ;;  %1015 = vst [vmem:[#allocation3 + $0x58] sm:$0x3] %v1009_v12  ;;  %2583 = vmatpush3.bf16.msra.mxu1 %v880_v13 }
 0x179   : > { %2588 = vmatprep.subr.bf16.mxu1 %v3005_v18 }
 0x17a   : > { %v1140_v15 = vpop.permute.xlu0 %1139  ;;  %v1142_v16 = vpop.permute.xlu1 %1141 }
 0x17b   : > { %v1147_v17 = vsel %vm1145_vm2, %v1140_v15, %v1142_v16  ;;  %v1018_v19 = vld [vmem:[#allocation3 + $0x50] sm:$0xff] }
 0x17c   : > { %1153 = vst [vmem:[#allocation3 + $0x68] sm:$0x3] %v1147_v17  ;;  %1028 = vmatprep.subr.bf16.mxu0 %v1018_v19 }
 0x17e   : > { %v1024_v20 = vpop.permute.xlu0 %1023  ;;  %v1138_v21 = vpop.permute.xlu1 %1137 }
 0x17f   : > { %v1146_v22 = vsel %vm1145_vm2, %v1138_v21, %v1140_v15  ;;  %2509 = vmatmul.mubr.msk.bf16.vlgmr.msra.gmra.mrb[0].mxu0 %vm613_vm15, %v885_v5  ;;  %2585 = vmatmul.mubr.msk.bf16.vlgmr.msra.gmra.mrb[0].mxu1 %vm613_vm15, %v885_v5  ;;  %v1017_v23 = vld [vmem:[#allocation3 + $0x48] sm:$0xff]  ;;  %v1019_v24 = vld [vmem:[#allocation3 + $0x58] sm:$0xff] }
 0x180   : > { %1152 = vst [vmem:[#allocation3 + $0x60] sm:$0x3] %v1146_v22  ;;  %1029 = vmatpush1.bf16.msra.mxu0 %v1017_v23  ;;  %2589 = vmatpush3.bf16.msra.mxu1 %v1019_v24 }
 0x181   : > { %1060 = vmatprep.mubr.bf16.mxu0 %v2987_v4  ;;  %2590 = vmatprep.mubr.msk.bf16.mxu1 %vm3006_vm1, %v3005_v18 }
 0x182   : > { %v1144_v25 = vpop.permute.xlu0 %1143  ;;  %v1279_v26 = vpop.permute.xlu1 %1278  ;;  %2594 = vmatprep.subr.bf16.mxu1 %v3005_v18 }
 0x183   : > { %v1148_v27 = vsel %vm1145_vm2, %v1142_v16, %v1144_v25  ;;  %v1157_v28 = vld [vmem:[#allocation3 + $0x68] sm:$0xff] }
 0x184   : > { %1154 = vst [vmem:[#allocation3 + $0x70] sm:$0x3] %v1148_v27  ;;  %1167 = vmatprep.subr.bf16.mxu0 %v1157_v28 }
 0x186   : > { %v1281_v29 = vpop.permute.xlu0 %1280  ;;  %v1163_v30 = vpop.permute.xlu1 %1162 }
 0x187   : > { %v1286_v31 = vsel %vm1284_vm3, %v1279_v26, %v1281_v29  ;;  %v1156_v36 = vld [vmem:[#allocation3 + $0x60] sm:$0xff] }
 0x188   : > { %1292 = vst [vmem:[#allocation3 + $0x80] sm:$0x3] %v1286_v31 }
 0x18a   : > { %v1277_v32 = vpop.permute.xlu0 %1276  ;;  %v1283_v33 = vpop.permute.xlu1 %1282 }
 0x18b   : > { %v1285_v34 = vsel %vm1284_vm3, %v1277_v32, %v1279_v26  ;;  %v1287_v35 = vsel %vm1284_vm3, %v1281_v29, %v1283_v33  ;;  %2512 = vmatmul.mubr.msk.bf16.vlgmr.msra.gmra.mrb[0].mxu0 %vm613_vm15, %v1024_v20  ;;  %2591 = vmatmul.mubr.msk.bf16.vlgmr.msra.gmra.mrb[0].mxu1 %vm613_vm15, %v1024_v20  ;;  %v1158_v37 = vld [vmem:[#allocation3 + $0x70] sm:$0xff] }
 0x18c   : > { %1291 = vst [vmem:[#allocation3 + $0x78] sm:$0x3] %v1285_v34  ;;  %1293 = vst [vmem:[#allocation3 + $0x88] sm:$0x3] %v1287_v35  ;;  %1168 = vmatpush1.bf16.msra.mxu0 %v1156_v36  ;;  %2595 = vmatpush3.bf16.msra.mxu1 %v1158_v37  ;;  %v1711_v34 = vld [vmem:[%s3534_s1 + $0x4] sm:$0xf] }
 0x18d   : > { %1199 = vmatprep.mubr.bf16.mxu0 %v2987_v4  ;;  %2596 = vmatprep.mubr.msk.bf16.mxu1 %vm3006_vm1, %v3005_v18 }
 0x18e   : > { %v1418_v38 = vpop.permute.xlu0 %1417  ;;  %v1420_v39 = vpop.permute.xlu1 %1419  ;;  %2600 = vmatprep.subr.bf16.mxu1 %v3005_v18 }
 0x18f   : > { %v1425_v40 = vsel %vm1423_vm4, %v1418_v38, %v1420_v39  ;;  %v1296_v41 = vld [vmem:[#allocation3 + $0x80] sm:$0xff] }
 0x190   : > { %1431 = vst [vmem:[#allocation3 + $0x98] sm:$0x3] %v1425_v40  ;;  %1306 = vmatprep.subr.bf16.mxu0 %v1296_v41 }
 0x192   : > { %v1302_v42 = vpop.permute.xlu0 %1301  ;;  %v1416_v43 = vpop.permute.xlu1 %1415 }
 0x193   : > { %v1424_v6 = vsel %vm1423_vm4, %v1416_v43, %v1418_v38  ;;  %v1295_v47 = vld [vmem:[#allocation3 + $0x78] sm:$0xff]  ;;  %v1297_v48 = vld [vmem:[#allocation3 + $0x88] sm:$0xff] }
 0x194   : > { %1430 = vst [vmem:[#allocation3 + $0x90] sm:$0x3] %v1424_v6 }
 0x196   : > { %v1422_v44 = vpop.permute.xlu0 %1421  ;;  %v1557_v45 = vpop.permute.xlu1 %1556 }
 0x197   : > { %v1426_v46 = vsel %vm1423_vm4, %v1420_v39, %v1422_v44  ;;  %2515 = vmatmul.mubr.msk.bf16.vlgmr.msra.gmra.mrb[0].mxu0 %vm613_vm15, %v1163_v30  ;;  %2597 = vmatmul.mubr.msk.bf16.vlgmr.msra.gmra.mrb[0].mxu1 %vm613_vm15, %v1163_v30  ;;  %v1435_v49 = vld [vmem:[#allocation3 + $0x98] sm:$0xff] }
 0x198   : > { %1432 = vst [vmem:[#allocation3 + $0xa0] sm:$0x3] %v1426_v46  ;;  %1307 = vmatpush1.bf16.msra.mxu0 %v1295_v47  ;;  %2601 = vmatpush3.bf16.msra.mxu1 %v1297_v48 }
 0x199   : > { %1445 = vmatprep.subr.bf16.mxu0 %v1435_v49  ;;  %1338 = vmatprep.mubr.bf16.mxu0 %v2987_v4 }
 0x19a   : > { %v1559_v50 = vpop.permute.xlu0 %1558  ;;  %v1441_v51 = vpop.permute.xlu1 %1440  ;;  %2602 = vmatprep.mubr.msk.bf16.mxu1 %vm3006_vm1, %v3005_v18  ;;  %2606 = vmatprep.subr.bf16.mxu1 %v3005_v18 }
 0x19b   : > { %v1564_v52 = vsel %vm1562_vm6, %v1557_v45, %v1559_v50  ;;  %v1434_v60 = vld [vmem:[#allocation3 + $0x90] sm:$0xff] }
 0x19c   : > { %1570 = vst [vmem:[#allocation3 + $0xb0] sm:$0x3] %v1564_v52 }
 0x19e   : > { %v1555_v53 = vpop.permute.xlu0 %1554  ;;  %v1561_v54 = vpop.permute.xlu1 %1560 }
 0x19f   : > { %v1563_v55 = vsel %vm1562_vm6, %v1555_v53, %v1557_v45  ;;  %v1565_v56 = vsel %vm1562_vm6, %v1559_v50, %v1561_v54  ;;  %v1436_v61 = vld [vmem:[#allocation3 + $0xa0] sm:$0xff] }
 0x1a0   : > { %1569 = vst [vmem:[#allocation3 + $0xa8] sm:$0x3] %v1563_v55  ;;  %1571 = vst [vmem:[#allocation3 + $0xb8] sm:$0x3] %v1565_v56 }
 0x1a2   : > { %v1696_v57 = vpop.permute.xlu0 %1695  ;;  %v1698_v58 = vpop.permute.xlu1 %1697 }
 0x1a3   : > { %v1703_v59 = vsel %vm1701_vm7, %v1696_v57, %v1698_v58  ;;  %2518 = vmatmul.mubr.msk.bf16.vlgmr.msra.gmra.mrb[0].mxu0 %vm613_vm15, %v1302_v42  ;;  %2603 = vmatmul.mubr.msk.bf16.vlgmr.msra.gmra.mrb[0].mxu1 %vm613_vm15, %v1302_v42  ;;  %v1574_v62 = vld [vmem:[#allocation3 + $0xb0] sm:$0xff] }
 0x1a4   : > { %1709 = vst [vmem:[#allocation3 + $0xc8] sm:$0x3] %v1703_v59  ;;  %1446 = vmatpush1.bf16.msra.mxu0 %v1434_v60  ;;  %2607 = vmatpush3.bf16.msra.mxu1 %v1436_v61 }
 0x1a5   : > { %1584 = vmatprep.subr.bf16.mxu0 %v1574_v62  ;;  %1477 = vmatprep.mubr.bf16.mxu0 %v2987_v4 }
 0x1a6   : > { %v1580_v63 = vpop.permute.xlu0 %1579  ;;  %v1694_v0 = vpop.permute.xlu1 %1693  ;;  %2608 = vmatprep.mubr.msk.bf16.mxu1 %vm3006_vm1, %v3005_v18  ;;  %2612 = vmatprep.subr.bf16.mxu1 %v3005_v18 }
 0x1a7   : > { %v1702_v1 = vsel %vm1701_vm7, %v1694_v0, %v1696_v57  ;;  %v1573_v11 = vld [vmem:[#allocation3 + $0xa8] sm:$0xff]  ;;  %v1575_v12 = vld [vmem:[#allocation3 + $0xb8] sm:$0xff] }
 0x1a8   : > { %1708 = vst [vmem:[#allocation3 + $0xc0] sm:$0x3] %v1702_v1 }
 0x1aa   : > { %v1700_v2 = vpop.permute.xlu0 %1699  ;;  %v1830_v3 = vpop.permute.xlu1 %1829 }
 0x1ab   : > { %v1704_v5 = vsel %vm1701_vm7, %v1698_v58, %v1700_v2  ;;  %v1713_v13 = vld [vmem:[#allocation3 + $0xc8] sm:$0xff] }
 0x1ac   : > { %1710 = vst [vmem:[#allocation3 + $0xd0] sm:$0x3] %v1704_v5 }
 0x1ae   : > { %v1832_v7 = vpop.permute.xlu0 %1831  ;;  %v1828_v8 = vpop.permute.xlu1 %1827 }
 0x1af   : > { %v1837_v9 = vsel %vm1835_vm8, %v1830_v3, %v1832_v7  ;;  %v1836_v10 = vsel %vm1835_vm8, %v1828_v8, %v1830_v3  ;;  %2521 = vmatmul.mubr.msk.bf16.vlgmr.msra.gmra.mrb[0].mxu0 %vm613_vm15, %v1441_v51  ;;  %2609 = vmatmul.mubr.msk.bf16.vlgmr.msra.gmra.mrb[0].mxu1 %vm613_vm15, %v1441_v51  ;;  %v1712_v25 = vld [vmem:[#allocation3 + $0xc0] sm:$0xff] }
 0x1b0   : > { %1843 = vst [vmem:[#allocation3 + $0xe0] sm:$0x3] %v1837_v9  ;;  %1842 = vst [vmem:[#allocation3 + $0xd8] sm:$0x3] %v1836_v10  ;;  %1585 = vmatpush1.bf16.msra.mxu0 %v1573_v11  ;;  %2613 = vmatpush3.bf16.msra.mxu1 %v1575_v12 }
 0x1b1   : > { %1718 = vmatprep.subr.bf16.mxu0 %v1713_v13  ;;  %1616 = vmatprep.mubr.bf16.mxu0 %v2987_v4 }
 0x1b2   : > { %v1834_v14 = vpop.permute.xlu0 %1833  ;;  %v1969_v15 = vpop.permute.xlu1 %1968  ;;  %2614 = vmatprep.mubr.msk.bf16.mxu1 %vm3006_vm1, %v3005_v18  ;;  %2618 = vmatprep.subr.bf16.mxu1 %v3005_v18 }
 0x1b3   : > { %v1838_v16 = vsel %vm1835_vm8, %v1832_v7, %v1834_v14  ;;  %v1714_v26 = vld [vmem:[#allocation3 + $0xd0] sm:$0xff] }
 0x1b4   : > { %1844 = vst [vmem:[#allocation3 + $0xe8] sm:$0x3] %v1838_v16 }
 0x1b6   : > { %v1971_v17 = vpop.permute.xlu0 %1970  ;;  %v1853_v19 = vpop.permute.xlu1 %1852 }
 0x1b7   : > { %v1976_v20 = vsel %vm1974_vm9, %v1969_v15, %v1971_v17  ;;  %v1847_v27 = vld [vmem:[#allocation3 + $0xe0] sm:$0xff]  ;;  %v1846_v38 = vld [vmem:[#allocation3 + $0xd8] sm:$0xff] }
 0x1b8   : > { %1982 = vst [vmem:[#allocation3 + $0xf8] sm:$0x3] %v1976_v20 }
 0x1ba   : > { %v1967_v21 = vpop.permute.xlu0 %1966  ;;  %v1973_v22 = vpop.permute.xlu1 %1972 }
 0x1bb   : > { %v1975_v23 = vsel %vm1974_vm9, %v1967_v21, %v1969_v15  ;;  %v1977_v24 = vsel %vm1974_vm9, %v1971_v17, %v1973_v22  ;;  %2524 = vmatmul.mubr.msk.bf16.vlgmr.msra.gmra.mrb[0].mxu0 %vm613_vm15, %v1580_v63  ;;  %2615 = vmatmul.mubr.msk.bf16.vlgmr.msra.gmra.mrb[0].mxu1 %vm613_vm15, %v1580_v63  ;;  %v1848_v39 = vld [vmem:[#allocation3 + $0xe8] sm:$0xff] }
 0x1bc   : > { %1981 = vst [vmem:[#allocation3 + $0xf0] sm:$0x3] %v1975_v23  ;;  %1983 = vst [vmem:[#allocation3 + $0x100] sm:$0x3] %v1977_v24  ;;  %1719 = vmatpush1.bf16.msra.mxu0 %v1712_v25  ;;  %2619 = vmatpush3.bf16.msra.mxu1 %v1714_v26 }
 0x1bd   : > { %1857 = vmatprep.subr.bf16.mxu0 %v1847_v27  ;;  %1750 = vmatprep.mubr.bf16.mxu0 %v2987_v4 }
 0x1be   : > { %v2108_v28 = vpop.permute.xlu0 %2107  ;;  %v2110_v29 = vpop.permute.xlu1 %2109  ;;  %2620 = vmatprep.mubr.msk.bf16.mxu1 %vm3006_vm1, %v3005_v18  ;;  %2624 = vmatprep.subr.bf16.mxu1 %v3005_v18 }
 0x1bf   : > { %v2115_v30 = vsel %vm2113_vm10, %v2108_v28, %v2110_v29  ;;  %v1986_v40 = vld [vmem:[#allocation3 + $0xf8] sm:$0xff] }
 0x1c0   : > { %2121 = vst [vmem:[#allocation3 + $0x110] sm:$0x3] %v2115_v30 }
 0x1c2   : > { %v1992_v31 = vpop.permute.xlu0 %1991  ;;  %v2106_v32 = vpop.permute.xlu1 %2105 }
 0x1c3   : > { %v2114_v33 = vsel %vm2113_vm10, %v2106_v32, %v2108_v28  ;;  %v1985_v47 = vld [vmem:[#allocation3 + $0xf0] sm:$0xff]  ;;  %v1987_v48 = vld [vmem:[#allocation3 + $0x100] sm:$0xff] }
 0x1c4   : > { %2120 = vst [vmem:[#allocation3 + $0x108] sm:$0x3] %v2114_v33 }
 0x1c6   : > { %v2112_v35 = vpop.permute.xlu0 %2111  ;;  %v2247_v36 = vpop.permute.xlu1 %2246 }
 0x1c7   : > { %v2116_v37 = vsel %vm2113_vm10, %v2110_v29, %v2112_v35  ;;  %2526 = vmatmul.mubr.msk.bf16.vlgmr.msra.gmra.mrb[0].mxu0 %vm613_vm15, %v1711_v34  ;;  %2621 = vmatmul.mubr.msk.bf16.vlgmr.msra.gmra.mrb[0].mxu1 %vm613_vm15, %v1711_v34  ;;  %v2125_v49 = vld [vmem:[#allocation3 + $0x110] sm:$0xff] }
 0x1c8   : > { %2122 = vst [vmem:[#allocation3 + $0x118] sm:$0x3] %v2116_v37  ;;  %1858 = vmatpush1.bf16.msra.mxu0 %v1846_v38  ;;  %2625 = vmatpush3.bf16.msra.mxu1 %v1848_v39 }
 0x1c9   : > { %1996 = vmatprep.subr.bf16.mxu0 %v1986_v40  ;;  %1889 = vmatprep.mubr.bf16.mxu0 %v2987_v4 }
 0x1ca   : > { %v2249_v41 = vpop.permute.xlu0 %2248  ;;  %v2131_v42 = vpop.permute.xlu1 %2130  ;;  %2626 = vmatprep.mubr.msk.bf16.mxu1 %vm3006_vm1, %v3005_v18  ;;  %2630 = vmatprep.subr.bf16.mxu1 %v3005_v18 }
 0x1cb   : > { %v2254_v43 = vsel %vm2252_vm11, %v2247_v36, %v2249_v41  ;;  %v2124_v50 = vld [vmem:[#allocation3 + $0x108] sm:$0xff] }
 0x1cc   : > { %2260 = vst [vmem:[#allocation3 + $0x128] sm:$0x3] %v2254_v43 }
 0x1ce   : > { %v2245_v6 = vpop.permute.xlu0 %2244  ;;  %v2251_v44 = vpop.permute.xlu1 %2250 }
 0x1cf   : > { %v2253_v45 = vsel %vm2252_vm11, %v2245_v6, %v2247_v36  ;;  %v2255_v46 = vsel %vm2252_vm11, %v2249_v41, %v2251_v44  ;;  %v2126_v51 = vld [vmem:[#allocation3 + $0x118] sm:$0xff] }
 0x1d0   : > { %2259 = vst [vmem:[#allocation3 + $0x120] sm:$0x3] %v2253_v45  ;;  %2261 = vst [vmem:[#allocation3 + $0x130] sm:$0x3] %v2255_v46 }
 0x1d2   : > { %v2270_v55 = vpop.permute.xlu0 %2269 }
 0x1d3   : > { %2529 = vmatmul.mubr.msk.bf16.vlgmr.msra.gmra.mrb[0].mxu0 %vm613_vm15, %v1853_v19  ;;  %2627 = vmatmul.mubr.msk.bf16.vlgmr.msra.gmra.mrb[0].mxu1 %vm613_vm15, %v1853_v19  ;;  %v2264_v52 = vld [vmem:[#allocation3 + $0x128] sm:$0xff] }
 0x1d4   : > { %1997 = vmatpush1.bf16.msra.mxu0 %v1985_v47  ;;  %2631 = vmatpush3.bf16.msra.mxu1 %v1987_v48 }
 0x1d5   : > { %2135 = vmatprep.subr.bf16.mxu0 %v2125_v49  ;;  %2028 = vmatprep.mubr.bf16.mxu0 %v2987_v4 }
 0x1d6   : > { %2632 = vmatprep.mubr.msk.bf16.mxu1 %vm3006_vm1, %v3005_v18  ;;  %2636 = vmatprep.subr.bf16.mxu1 %v3005_v18 }
 0x1d7   : > { %v2263_v53 = vld [vmem:[#allocation3 + $0x120] sm:$0xff]  ;;  %v2265_v54 = vld [vmem:[#allocation3 + $0x130] sm:$0xff] }
 0x1df   : > { %2532 = vmatmul.mubr.msk.bf16.vlgmr.msra.gmra.mrb[0].mxu0 %vm613_vm15, %v1992_v31  ;;  %2633 = vmatmul.mubr.msk.bf16.vlgmr.msra.gmra.mrb[0].mxu1 %vm613_vm15, %v1992_v31 }
 0x1e0   : > { %2136 = vmatpush1.bf16.msra.mxu0 %v2124_v50  ;;  %2637 = vmatpush3.bf16.msra.mxu1 %v2126_v51  ;;  %v611_v56 = vpop.permute.xlu1 %610 }
 0x1e1   : > { %2274 = vmatprep.subr.bf16.mxu0 %v2264_v52  ;;  %2167 = vmatprep.mubr.bf16.mxu0 %v2987_v4 }
 0x1e2   : > { %2638 = vmatprep.mubr.msk.bf16.mxu1 %vm3006_vm1, %v3005_v18  ;;  %2642 = vmatprep.subr.bf16.mxu1 %v3005_v18 }
 0x1eb   : > { %2535 = vmatmul.mubr.msk.bf16.vlgmr.msra.gmra.mrb[0].mxu0 %vm613_vm15, %v2131_v42  ;;  %2639 = vmatmul.mubr.msk.bf16.vlgmr.msra.gmra.mrb[0].mxu1 %vm613_vm15, %v2131_v42 }
 0x1ec   : > { %2275 = vmatpush1.bf16.msra.mxu0 %v2263_v53  ;;  %2643 = vmatpush3.bf16.msra.mxu1 %v2265_v54 }
 0x1ed   : > { %2306 = vmatprep.mubr.bf16.mxu0 %v2987_v4  ;;  %2644 = vmatprep.mubr.msk.bf16.mxu1 %vm3006_vm1, %v3005_v18 }
 0x1f7   : > { %2538 = vmatmul.mubr.msk.bf16.vlgmr.msra.gmra.mrb[0].mxu0 %vm613_vm15, %v2270_v55  ;;  %2645 = vmatmul.mubr.msk.bf16.vlgmr.msra.gmra.mrb[0].mxu1 %vm613_vm15, %v2270_v55 }
 0x2ca   : > { %v2308_v57 = vpop.f32.mrb[0].mxu0  ;;  %v2349_v58 = vpop.f32.mrb[0].mxu1 }
 0x2cb   : > { %v2650_v59 = vadd.f32 %v2308_v57, %v611_v56  ;;  %v2656_v60 = vadd.f32 %v2349_v58, %v611_v56  ;;  %v2310_v4 = vpop.f32.mrb[1].mxu0  ;;  %v2646_v61 = vpop.f32.mrb[1].mxu1 }
 0x2cc   : > { %v2653_v62 = vadd.f32 %v2310_v4, %v611_v56  ;;  %v2312_v18 = vpop.f32.mrb[2].mxu0  ;;  %v2352_v63 = vpop.f32.mrb[2].mxu1 }
 0x2cd   : > { %2361 = vst [vmem:[%s228_s22] sm:$0xff] %v2650_v59  ;;  %2363 = vst [vmem:[%s228_s22 + $0x10] sm:$0xff] %v2656_v60  ;;  %v2313_v0 = vpop.f32.mrb[3].mxu0  ;;  %v2647_v1 = vpop.f32.mrb[3].mxu1 }
 0x2ce   : > { %2362 = vst [vmem:[%s228_s22 + $0x8] sm:$0xff] %v2653_v62 }
 0x2cf   : > { %2914 = shalt.err (!%p2911_p6)
}
 0x2d0   : > { %s2915_s5 = scalar_lea.hbm %s3484_s29, 384  ;;  %s2919_s24 = scalar_lea.hbm %s3536_s3, 768 }
 0x2d1   : > { %p2916_p4 = scmp.ne.s32.totalorder %s3484_s29, %s2915_s5  ;;  %p2920_p1 = scmp.lt.u32.totalorder %s3484_s29, %s3536_s3 }
 0x2d2   : > { %p2921_p2 = scmp.lt.u32.totalorder %s2919_s24, %s2915_s5  ;;  %p2923_p8 = scmp.lt.u32.totalorder %s2915_s5, %s3484_s29 }
 0x2d3   : > { %p2917_p10 = pnand %p2916_p4, %p3545_p9 }
 0x2d4   : > { %p2922_p5 = por %p2921_p2, %p2920_p1 }
 0x2d5   : > { %p2918_p12 = pneg %p2917_p10 }
 0x2d6   : > { %p2924_p11 = por %p2923_p8, %p2922_p5 }
 0x2d8   : > { %p2925_p0 = pnand %p2924_p11, %p2918_p12 }
 0x2da   : > { %2928 = shalt.err (!%p2925_p0)
}
 0x2db   : > { %2757 = dma.vmem_to_hbm [thread:$0]  (%p3545_p9), %s3486_s23, 384, %s3484_s29, %s2365_s15  }
 0x2dc PF: > { %s2393_s10 = sand.u32 1, %s2963_s12   ;;  %p3546_p7 = scmp.ne.s32.totalorder %s3541_s27, 0 }
 0x2dd   : > { %p3547_p13 = scmp.ge.s32.totalorder %s2983_s17, 2  ;;  %s2394_s21 = scalar_lea.sflag [#allocation6], %s2393_s10 }
 0x2df   : > { %p2764_p3 = pnand %p3547_p13, %p3546_p7 }
 0x2e1   : > { %2958 = dma.done.wait (!%p2764_p3), %s2394_s21, 384  }
 0x2e2   : > { %2960 = vsyncadd (!%p2764_p3), %s2394_s21, 4294966912  ;;  %s19_s17 = sadd.s32 1, %s2983_s17   ;;  %s3548_s12 = smov %s2967_s13 }
 0x2e3   : > { %p16_p6 = scmp.ge.s32.totalorder %s19_s17, 4   ;;  %s3549_s13 = smov %s2971_s14 }
 0x2e4   : > { %s3550_s14 = smov %s3102_s26  ;;  %s3551_s15 = smov %s2979_s16 }
 0x2e5   : > { %s3552_s16 = smov %s3554_s20  ;;  %18 = sbr.rel (!%p16_p6) target bundleno = 6 (0x6), region = 83 }
 0x2ec   :  { %2399 = vsyncpa [#allocation5], 1 }
 0x2ed   :  { %2401 = vsyncpa [#allocation5 + $0x1], 1 }
 0x2ee   :  { %2402 = vsyncpa [#allocation6], 1 }
 0x2ef   :  { %2404 = vsyncpa [#allocation6 + $0x1], 1 }

</bundles_post_ra>
